<compile_context>
chip_gen: v7x
topology: tpu7x:2x2x1
jax: 0.10.0
libtpu: 0.0.40
codegen_flags: <defaults>
</compile_context>

<pallas_src>
import functools

import jax
import jax.numpy as jnp
from jax import lax
from jax.experimental import pallas as pl
from jax.experimental.pallas import tpu as pltpu

F32 = jnp.float32
BF16 = jnp.bfloat16


# ---------------- generation-aware limits ----------------

def _tpu_vmem_bytes():
    try:
        info = pltpu.get_tpu_info()
        v = getattr(info, "vmem_capacity_bytes", None)
        if v:
            return int(v)
    except Exception:
        pass
    return 64 * 1024 * 1024  # conservative (v7x-sized) fallback


_VMEM_PHYS = _tpu_vmem_bytes()
_VMEM_LIMIT = int(_VMEM_PHYS * 3 // 4)          # ~96 MiB on v5e/v6e, ~48 MiB on v7x
_BIG_VMEM = _VMEM_PHYS >= 96 * 1024 * 1024
_ROW_TARGET = 512 if _BIG_VMEM else 256          # row-tile target (multiple of 16)
_COL_TARGET = 1024 if _BIG_VMEM else 512         # col-tile target (multiple of 128)
_VOCAB_TARGET = 2048 if _BIG_VMEM else 1024


def _cp(dims):
    return pltpu.CompilerParams(dimension_semantics=dims,
                                vmem_limit_bytes=_VMEM_LIMIT)


def _pick_tile(n, target, align):
    """Largest tile <= target that divides n and is a multiple of `align`,
    else the full dimension (always a legal block)."""
    t = (min(target, n) // align) * align
    while t >= align:
        if n % t == 0:
            return t
        t -= align
    return n


# ---------------- Pallas kernels ----------------

def linear_bias_kernel(x_ref, w_ref, b_ref, o_ref):
    acc = jnp.dot(x_ref[...].astype(BF16), w_ref[...],
                  preferred_element_type=jnp.float32)
    o_ref[...] = (acc + b_ref[...]).astype(o_ref.dtype)


def linear_gelu_kernel(x_ref, w_ref, b_ref, o_ref):
    h = jnp.dot(x_ref[...].astype(BF16), w_ref[...],
                preferred_element_type=jnp.float32) + b_ref[...]
    # tanh-approx GELU: transcendental sits on the EUP slot (v5e has no bf16 VPU/EUP,
    # and erf's VPU polynomial would become the binding slot behind the MXU there).
    c = jnp.float32(0.7978845608028654)  # sqrt(2/pi)
    o_ref[...] = (0.5 * h * (1.0 + jnp.tanh(c * (h + 0.044715 * h * h * h)))
                  ).astype(o_ref.dtype)


def layernorm_kernel(x_ref, g_ref, b_ref, o_ref):
    x = x_ref[...].astype(jnp.float32)
    mu = jnp.mean(x, axis=-1, keepdims=True)
    var = jnp.mean(jnp.square(x - mu), axis=-1, keepdims=True)
    o_ref[...] = ((x - mu) * lax.rsqrt(var + 1e-12) * g_ref[...]
                  + b_ref[...]).astype(o_ref.dtype)


def linear_residual_layernorm_kernel(x_ref, w_ref, b_ref, r_ref, g_ref, bb_ref, o_ref):
    # fused:  LayerNorm( x @ W + bias + residual )
    h = jnp.dot(x_ref[...].astype(BF16), w_ref[...],
                preferred_element_type=jnp.float32)
    h = h + b_ref[...] + r_ref[...].astype(jnp.float32)
    mu = jnp.mean(h, axis=-1, keepdims=True)
    var = jnp.mean(jnp.square(h - mu), axis=-1, keepdims=True)
    o_ref[...] = ((h - mu) * lax.rsqrt(var + 1e-12) * g_ref[...]
                  + bb_ref[...]).astype(o_ref.dtype)


def attention_kernel(q_ref, k_ref, v_ref, m_ref, o_ref, *, scale):
    # One (batch, head) pair per grid step: q/k/v are (1,1,S,Dh), mask is (1,1,S).
    q = q_ref[0, 0]                                    # (S, Dh) bf16
    k = k_ref[0, 0]
    v = v_ref[0, 0]
    S = q.shape[0]

    s = jnp.einsum('qd,kd->qk', q, k,
                   preferred_element_type=jnp.float32) * jnp.float32(scale)

    # single (S, S) causal mask + (1, S) padding mask, built in-kernel
    row = lax.broadcasted_iota(jnp.int32, (S, S), 0)
    col = lax.broadcasted_iota(jnp.int32, (S, S), 1)
    keep = m_ref[0] > 0.5                              # (1, S) broadcasts over queries
    valid = (col <= row) & keep
    s = jnp.where(valid, s, jnp.float32(-1e9))

    s = s - jnp.max(s, axis=-1, keepdims=True)
    p = jnp.exp(s)
    p = p * pl.reciprocal(jnp.sum(p, axis=-1, keepdims=True), approx=True)

    ctx = jnp.dot(p.astype(BF16), v, preferred_element_type=jnp.float32)
    o_ref[0, 0] = ctx.astype(o_ref.dtype)


def classify_lse_kernel(x_ref, w_ref, b_ref, lse_ref, m_sc, l_sc):
    # pass 1: online (running max / sum) log-sum-exp over vocab tiles
    j = pl.program_id(1)

    @pl.when(j == 0)
    def _():
        m_sc[...] = jnp.full_like(m_sc, -jnp.inf)
        l_sc[...] = jnp.zeros_like(l_sc)

    logits = jnp.dot(x_ref[...].astype(BF16), w_ref[...],
                     preferred_element_type=jnp.float32) + b_ref[...]
    m_new = jnp.maximum(m_sc[...], jnp.max(logits, axis=-1, keepdims=True))
    l_sc[...] = (l_sc[...] * jnp.exp(m_sc[...] - m_new)
                 + jnp.sum(jnp.exp(logits - m_new), axis=-1, keepdims=True))
    m_sc[...] = m_new

    @pl.when(j == pl.num_programs(1) - 1)
    def _():
        lse_ref[...] = m_sc[...] + jnp.log(l_sc[...])


def classify_probs_kernel(x_ref, w_ref, b_ref, lse_ref, o_ref):
    # pass 2: recompute logits per vocab tile and emit normalized probs (bf16)
    logits = jnp.dot(x_ref[...].astype(BF16), w_ref[...],
                     preferred_element_type=jnp.float32) + b_ref[...]
    o_ref[...] = jnp.exp(logits - lse_ref[...]).astype(o_ref.dtype)


# ---------------- pallas_call wrappers (tiled grids) ----------------
# NOTE on GEMM grid order: the column (weight) axis is the OUTER grid axis and the
# row axis is innermost, so the (K, tn) weight tile stays resident across the inner
# loop instead of being re-DMA'd every step.

def linear_bias(x, w, b):
    R, K = x.shape
    N = w.shape[1]
    tr = _pick_tile(R, _ROW_TARGET, 16)
    tn = _pick_tile(N, _COL_TARGET, 128)
    return pl.pallas_call(
        linear_bias_kernel,
        grid=(N // tn, R // tr),
        in_specs=[pl.BlockSpec((tr, K), lambda j, i: (i, 0)),
                  pl.BlockSpec((K, tn), lambda j, i: (0, j)),
                  pl.BlockSpec((1, tn), lambda j, i: (0, j))],
        out_specs=pl.BlockSpec((tr, tn), lambda j, i: (i, j)),
        out_shape=jax.ShapeDtypeStruct((R, N), BF16),
        compiler_params=_cp(("parallel", "parallel")),
    )(x, w, b)


def linear_gelu(x, w, b):
    R, K = x.shape
    N = w.shape[1]
    tr = _pick_tile(R, _ROW_TARGET, 16)
    tn = _pick_tile(N, _COL_TARGET, 128)
    return pl.pallas_call(
        linear_gelu_kernel,
        grid=(N // tn, R // tr),
        in_specs=[pl.BlockSpec((tr, K), lambda j, i: (i, 0)),
                  pl.BlockSpec((K, tn), lambda j, i: (0, j)),
                  pl.BlockSpec((1, tn), lambda j, i: (0, j))],
        out_specs=pl.BlockSpec((tr, tn), lambda j, i: (i, j)),
        out_shape=jax.ShapeDtypeStruct((R, N), BF16),
        compiler_params=_cp(("parallel", "parallel")),
    )(x, w, b)


def layernorm(x, g, b):
    R, D = x.shape
    tr = _pick_tile(R, _ROW_TARGET, 16)
    return pl.pallas_call(
        layernorm_kernel,
        grid=(R // tr,),
        in_specs=[pl.BlockSpec((tr, D), lambda i: (i, 0)),
                  pl.BlockSpec((1, D), lambda i: (0, 0)),
                  pl.BlockSpec((1, D), lambda i: (0, 0))],
        out_specs=pl.BlockSpec((tr, D), lambda i: (i, 0)),
        out_shape=jax.ShapeDtypeStruct((R, D), BF16),
        compiler_params=_cp(("parallel",)),
    )(x, g, b)


def linear_residual_layernorm(x, w, b, residual, g, bb):
    R, K = x.shape
    D = w.shape[1]
    tr = _pick_tile(R, _ROW_TARGET, 16)
    return pl.pallas_call(
        linear_residual_layernorm_kernel,
        grid=(R // tr,),
        in_specs=[pl.BlockSpec((tr, K), lambda i: (i, 0)),
                  pl.BlockSpec((K, D), lambda i: (0, 0)),
                  pl.BlockSpec((1, D), lambda i: (0, 0)),
                  pl.BlockSpec((tr, D), lambda i: (i, 0)),
                  pl.BlockSpec((1, D), lambda i: (0, 0)),
                  pl.BlockSpec((1, D), lambda i: (0, 0))],
        out_specs=pl.BlockSpec((tr, D), lambda i: (i, 0)),
        out_shape=jax.ShapeDtypeStruct((R, D), BF16),
        compiler_params=_cp(("parallel",)),
    )(x, w, b, residual, g, bb)


def attention(q, k, v, mask, *, scale):
    # grid over (batch, head): per-step VMEM is O(S*Dh + S*S), and both grid axes
    # are parallel so v7x's 2 TensorCores can shard the work.
    B, H, S, Dh = q.shape
    kern = functools.partial(attention_kernel, scale=scale)
    return pl.pallas_call(
        kern,
        grid=(B, H),
        in_specs=[pl.BlockSpec((1, 1, S, Dh), lambda b, h: (b, h, 0, 0)),
                  pl.BlockSpec((1, 1, S, Dh), lambda b, h: (b, h, 0, 0)),
                  pl.BlockSpec((1, 1, S, Dh), lambda b, h: (b, h, 0, 0)),
                  pl.BlockSpec((1, 1, S), lambda b, h: (b, 0, 0))],
        out_specs=pl.BlockSpec((1, 1, S, Dh), lambda b, h: (b, h, 0, 0)),
        out_shape=jax.ShapeDtypeStruct((B, H, S, Dh), BF16),
        compiler_params=_cp(("parallel", "parallel")),
    )(q, k, v, mask)


def classify_softmax(x, w, b):
    # vocab-tiled classifier + softmax (online LSE pass, then prob pass), bf16 output
    R, K = x.shape
    V = w.shape[1]
    tr = _pick_tile(R, _ROW_TARGET, 16)
    tv = _pick_tile(V, _VOCAB_TARGET, 128)

    lse = pl.pallas_call(
        classify_lse_kernel,
        grid=(R // tr, V // tv),
        in_specs=[pl.BlockSpec((tr, K), lambda i, j: (i, 0)),
                  pl.BlockSpec((K, tv), lambda i, j: (0, j)),
                  pl.BlockSpec((1, tv), lambda i, j: (0, j))],
        out_specs=pl.BlockSpec((tr, 1), lambda i, j: (i, 0)),
        out_shape=jax.ShapeDtypeStruct((R, 1), jnp.float32),
        scratch_shapes=[pltpu.VMEM((tr, 1), jnp.float32),
                        pltpu.VMEM((tr, 1), jnp.float32)],
        compiler_params=_cp(("parallel", "arbitrary")),
    )(x, w, b)

    probs = pl.pallas_call(
        classify_probs_kernel,
        grid=(V // tv, R // tr),   # weight tile resident across inner row loop
        in_specs=[pl.BlockSpec((tr, K), lambda j, i: (i, 0)),
                  pl.BlockSpec((K, tv), lambda j, i: (0, j)),
                  pl.BlockSpec((1, tv), lambda j, i: (0, j)),
                  pl.BlockSpec((tr, 1), lambda j, i: (i, 0))],
        out_specs=pl.BlockSpec((tr, tv), lambda j, i: (i, j)),
        out_shape=jax.ShapeDtypeStruct((R, V), BF16),
        compiler_params=_cp(("parallel", "parallel")),
    )(x, w, b, lse)
    return probs


# ---------------- parameter init (deterministic, synthetic) ----------------

def init_params(key, vocab, hidden, layers, heads, intermediate, max_pos):
    ks = iter(jax.random.split(key, 8 + layers * 8))
    std = 0.02

    def nrm(shape, dt=BF16):
        return (std * jax.random.normal(next(ks), shape)).astype(dt)

    p = {
        'word_emb': nrm((vocab, hidden), F32),
        'pos_emb': nrm((max_pos, hidden), F32),
        'type_emb': nrm((2, hidden), F32),
        'emb_ln_g': jnp.ones((1, hidden), F32),
        'emb_ln_b': jnp.zeros((1, hidden), F32),
        'cls_w': nrm((hidden, vocab), BF16),
        'cls_b': jnp.zeros((1, vocab), F32),
        'layers': [],
    }
    for _ in range(layers):
        lyr = {
            # fused QKV projection (wq | wk | wv), each block laid out (head, Dh)
            'wqkv': nrm((hidden, 3 * hidden), BF16),
            'bqkv': jnp.zeros((1, 3 * hidden), F32),
            'wo': nrm((hidden, hidden), BF16), 'bo': jnp.zeros((1, hidden), F32),
            'ln1_g': jnp.ones((1, hidden), F32), 'ln1_b': jnp.zeros((1, hidden), F32),
            'wi': nrm((hidden, intermediate), BF16),
            'bi': jnp.zeros((1, intermediate), F32),
            'wf': nrm((intermediate, hidden), BF16),
            'bf': jnp.zeros((1, hidden), F32),
            'ln2_g': jnp.ones((1, hidden), F32), 'ln2_b': jnp.zeros((1, hidden), F32),
        }
        p['layers'].append(lyr)
    return p


# ---------------- forward ----------------

def language_model_forward(params, x_ids, attention_mask, *, heads):
    B, S = x_ids.shape
    D = params['word_emb'].shape[1]
    Dh = D // heads
    scale = 1.0 / float(Dh) ** 0.5

    # --- embeddings (gather is glue; LayerNorm is a kernel) ---
    emb = (params['word_emb'][x_ids]
           + params['pos_emb'][:S][None, :, :]
           + params['type_emb'][0][None, None, :])
    h = layernorm(emb.reshape(B * S, D), params['emb_ln_g'], params['emb_ln_b'])
    # dropout(0.1) -> identity (eval-mode semantics)

    # padding mask kept as O(B*S); causal structure is generated inside the kernel
    mask = attention_mask.astype(jnp.float32).reshape(B, 1, S)

    # TODO(synk): stack per-layer weights into (L, ...) arrays with a layer grid axis
    #             (or cross-call weight prefetch) to cut per-layer dispatch/HBM
    #             round trips; kept as a Python loop here.
    for lyr in params['layers']:
        # self-attention: fused QKV matmul -> per-(batch, head) attention kernel
        qkv = linear_bias(h, lyr['wqkv'], lyr['bqkv'])               # (B*S, 3D)
        qkv = qkv.reshape(B, S, 3, heads, Dh).transpose(2, 0, 3, 1, 4)  # (3,B,H,S,Dh)
        # TODO(synk): fold the head split/merge into the wqkv/wo column layout and
        #             the attention BlockSpecs to avoid these XLA-side transposes.
        ctx = attention(qkv[0], qkv[1], qkv[2], mask, scale=scale)   # (B,H,S,Dh)
        ctx = ctx.transpose(0, 2, 1, 3).reshape(B * S, D)
        h = linear_residual_layernorm(ctx, lyr['wo'], lyr['bo'], h,
                                      lyr['ln1_g'], lyr['ln1_b'])
        # cross-attention block (add_cross_attention=True) is skipped by HF when no
        # encoder_hidden_states are passed, as in this forward.

        # feed-forward: matmul+bias+GELU fused, then matmul+bias+residual+LN fused
        inter = linear_gelu(h, lyr['wi'], lyr['bi'])
        h = linear_residual_layernorm(inter, lyr['wf'], lyr['bf'], h,
                                      lyr['ln2_g'], lyr['ln2_b'])

    # --- classify + softmax (inference path, y is None); vocab-tiled, bf16 output ---
    V = params['cls_w'].shape[1]
    probs = classify_softmax(h, params['cls_w'], params['cls_b'])
    return probs.reshape(B, S, V)


# ---------------- main ----------------

if __name__ == "__main__":
    B, S = 2, 8
    VOCAB, HIDDEN, LAYERS, HEADS, INTER, MAX_POS = 128, 32, 2, 4, 64, 16

    key = jax.random.PRNGKey(0)
    k_param, k_ids = jax.random.split(key)

    params = init_params(k_param, VOCAB, HIDDEN, LAYERS, HEADS, INTER, MAX_POS)
    x_ids = jax.random.randint(k_ids, (B, S), 1, VOCAB, dtype=jnp.int32)
    attn_mask = jnp.ones((B, S), jnp.float32)

    fwd = jax.jit(functools.partial(language_model_forward, heads=HEADS))
    probs = jax.block_until_ready(fwd(params, x_ids, attn_mask))

    assert probs.shape == (B, S, VOCAB)
    row_sums = jnp.sum(probs.astype(jnp.float32), axis=-1)
    assert bool(jnp.all(jnp.abs(row_sums - 1.0) < 5e-3))
    print("KERNEL_OK")
</pallas_src>

<mosaic_0001>
module attributes {stable_mosaic.version = 11 : i64} {
  func.func @layernorm_kernel(%arg0: i32, %arg1: memref<16x32xf32, #tpu.memory_space<vmem>>, %arg2: memref<1x32xf32, #tpu.memory_space<vmem>>, %arg3: memref<1x32xf32, #tpu.memory_space<vmem>>, %arg4: memref<16x32xbf16, #tpu.memory_space<vmem>>) attributes {dimension_semantics = [#tpu.dimension_semantics<parallel>], iteration_bounds = array<i64: 1>, scalar_prefetch = 0 : i64, scratch_operands = 0 : i64, tpu.core_type = #tpu.core_type<tc>, window_params = [{transform_indices = @transform_0, window_bounds = array<i64: 16, 32>}, {pipeline_mode = #tpu.pipeline_mode<synchronous>, transform_indices = @transform_1, window_bounds = array<i64: 1, 32>}, {pipeline_mode = #tpu.pipeline_mode<synchronous>, transform_indices = @transform_2, window_bounds = array<i64: 1, 32>}, {transform_indices = @transform_3, window_bounds = array<i64: 16, 32>}]} {
    %c0 = arith.constant 0 : index
    %c0_0 = arith.constant 0 : index
    %0 = vector.load %arg1[%c0, %c0_0] : memref<16x32xf32, #tpu.memory_space<vmem>>, vector<16x32xf32>
    %cst = arith.constant dense<0.000000e+00> : vector<16xf32>
    %1 = vector.multi_reduction <add>, %0, %cst [1] : vector<16x32xf32> to vector<16xf32>
    %2 = vector.shape_cast %1 : vector<16xf32> to vector<16x1xf32>
    %cst_1 = arith.constant 3.200000e+01 : f32
    %3 = vector.broadcast %cst_1 : f32 to vector<16x1xf32>
    %4 = arith.divf %2, %3 : vector<16x1xf32>
    %5 = vector.broadcast %4 : vector<16x1xf32> to vector<16x32xf32>
    %6 = arith.subf %0, %5 : vector<16x32xf32>
    %7 = arith.mulf %6, %6 : vector<16x32xf32>
    %cst_2 = arith.constant dense<0.000000e+00> : vector<16xf32>
    %8 = vector.multi_reduction <add>, %7, %cst_2 [1] : vector<16x32xf32> to vector<16xf32>
    %9 = vector.shape_cast %8 : vector<16xf32> to vector<16x1xf32>
    %cst_3 = arith.constant 3.200000e+01 : f32
    %10 = vector.broadcast %cst_3 : f32 to vector<16x1xf32>
    %11 = arith.divf %9, %10 : vector<16x1xf32>
    %12 = vector.broadcast %4 : vector<16x1xf32> to vector<16x32xf32>
    %13 = arith.subf %0, %12 : vector<16x32xf32>
    %cst_4 = arith.constant 9.99999996E-13 : f32
    %14 = vector.broadcast %cst_4 : f32 to vector<16x1xf32>
    %15 = arith.addf %11, %14 : vector<16x1xf32>
    %16 = math.rsqrt %15 : vector<16x1xf32>
    %17 = vector.broadcast %16 : vector<16x1xf32> to vector<16x32xf32>
    %18 = arith.mulf %13, %17 : vector<16x32xf32>
    %c0_5 = arith.constant 0 : index
    %c0_6 = arith.constant 0 : index
    %19 = vector.load %arg2[%c0_5, %c0_6] : memref<1x32xf32, #tpu.memory_space<vmem>>, vector<1x32xf32>
    %20 = vector.broadcast %19 : vector<1x32xf32> to vector<16x32xf32>
    %21 = arith.mulf %18, %20 : vector<16x32xf32>
    %c0_7 = arith.constant 0 : index
    %c0_8 = arith.constant 0 : index
    %22 = vector.load %arg3[%c0_7, %c0_8] : memref<1x32xf32, #tpu.memory_space<vmem>>, vector<1x32xf32>
    %23 = vector.broadcast %22 : vector<1x32xf32> to vector<16x32xf32>
    %24 = arith.addf %21, %23 : vector<16x32xf32>
    %25 = arith.truncf %24 : vector<16x32xf32> to vector<16x32xbf16>
    %c0_9 = arith.constant 0 : index
    %c0_10 = arith.constant 0 : index
    %26 = vector.load %arg4[%c0_9, %c0_10] : memref<16x32xbf16, #tpu.memory_space<vmem>>, vector<16x32xbf16>
    tpu.vector_store %arg4[%c0_9, %c0_10], %25 {strides = array<i32>} : memref<16x32xbf16, #tpu.memory_space<vmem>>, vector<16x32xbf16>,
    return
  }
  func.func @transform_0(%arg0: i32) -> (i32, i32) {
    %c0_i32 = arith.constant 0 : i32
    %c0_i32_0 = arith.constant 0 : i32
    return %arg0, %c0_i32 : i32, i32
  }
  func.func @transform_1(%arg0: i32) -> (i32, i32) {
    %c0_i32 = arith.constant 0 : i32
    %c0_i32_0 = arith.constant 0 : i32
    %c0_i32_1 = arith.constant 0 : i32
    return %c0_i32, %c0_i32_0 : i32, i32
  }
  func.func @transform_2(%arg0: i32) -> (i32, i32) {
    %c0_i32 = arith.constant 0 : i32
    %c0_i32_0 = arith.constant 0 : i32
    %c0_i32_1 = arith.constant 0 : i32
    return %c0_i32, %c0_i32_0 : i32, i32
  }
  func.func @transform_3(%arg0: i32) -> (i32, i32) {
    %c0_i32 = arith.constant 0 : i32
    %c0_i32_0 = arith.constant 0 : i32
    return %arg0, %c0_i32 : i32, i32
  }
}

module attributes {stable_mosaic.version = 11 : i64} {
  func.func @linear_bias_kernel(%arg0: i32, %arg1: i32, %arg2: memref<16x32xbf16, #tpu.memory_space<vmem>>, %arg3: memref<32x96xbf16, #tpu.memory_space<vmem>>, %arg4: memref<1x96xf32, #tpu.memory_space<vmem>>, %arg5: memref<16x96xbf16, #tpu.memory_space<vmem>>) attributes {dimension_semantics = [#tpu.dimension_semantics<parallel>, #tpu.dimension_semantics<parallel>], iteration_bounds = array<i64: 1, 1>, scalar_prefetch = 0 : i64, scratch_operands = 0 : i64, tpu.core_type = #tpu.core_type<tc>, window_params = [{transform_indices = @transform_0, window_bounds = array<i64: 16, 32>}, {transform_indices = @transform_1, window_bounds = array<i64: 32, 96>}, {transform_indices = @transform_2, window_bounds = array<i64: 1, 96>}, {transform_indices = @transform_3, window_bounds = array<i64: 16, 96>}]} {
    %c0 = arith.constant 0 : index
    %c0_0 = arith.constant 0 : index
    %0 = vector.load %arg2[%c0, %c0_0] : memref<16x32xbf16, #tpu.memory_space<vmem>>, vector<16x32xbf16>
    %c0_1 = arith.constant 0 : index
    %c0_2 = arith.constant 0 : index
    %1 = vector.load %arg3[%c0_1, %c0_2] : memref<32x96xbf16, #tpu.memory_space<vmem>>, vector<32x96xbf16>
    %cst = arith.constant dense<0.000000e+00> : vector<16x96xf32>
    %2 = tpu.matmul %0, %1, %cst {dimension_numbers = #tpu.dot_dimension_numbers<[1], [0], [0], [1], [0, 0, 1, 1], [], []>} : vector<16x32xbf16>, vector<32x96xbf16>, vector<16x96xf32> -> vector<16x96xf32>
    %c0_3 = arith.constant 0 : index
    %c0_4 = arith.constant 0 : index
    %3 = vector.load %arg4[%c0_3, %c0_4] : memref<1x96xf32, #tpu.memory_space<vmem>>, vector<1x96xf32>
    %4 = vector.broadcast %3 : vector<1x96xf32> to vector<16x96xf32>
    %5 = arith.addf %2, %4 : vector<16x96xf32>
    %6 = arith.truncf %5 : vector<16x96xf32> to vector<16x96xbf16>
    %c0_5 = arith.constant 0 : index
    %c0_6 = arith.constant 0 : index
    %7 = vector.load %arg5[%c0_5, %c0_6] : memref<16x96xbf16, #tpu.memory_space<vmem>>, vector<16x96xbf16>
    tpu.vector_store %arg5[%c0_5, %c0_6], %6 {strides = array<i32>} : memref<16x96xbf16, #tpu.memory_space<vmem>>, vector<16x96xbf16>,
    return
  }
  func.func @transform_0(%arg0: i32, %arg1: i32) -> (i32, i32) {
    %c0_i32 = arith.constant 0 : i32
    %c0_i32_0 = arith.constant 0 : i32
    return %arg1, %c0_i32 : i32, i32
  }
  func.func @transform_1(%arg0: i32, %arg1: i32) -> (i32, i32) {
    %c0_i32 = arith.constant 0 : i32
    %c0_i32_0 = arith.constant 0 : i32
    return %c0_i32, %arg0 : i32, i32
  }
  func.func @transform_2(%arg0: i32, %arg1: i32) -> (i32, i32) {
    %c0_i32 = arith.constant 0 : i32
    %c0_i32_0 = arith.constant 0 : i32
    return %c0_i32, %arg0 : i32, i32
  }
  func.func @transform_3(%arg0: i32, %arg1: i32) -> (i32, i32) {
    %c0_i32 = arith.constant 0 : i32
    return %arg1, %arg0 : i32, i32
  }
}

module attributes {stable_mosaic.version = 11 : i64} {
  func.func @attention_kernel(%arg0: i32, %arg1: i32, %arg2: memref<1x1x8x8xbf16, #tpu.memory_space<vmem>>, %arg3: memref<1x1x8x8xbf16, #tpu.memory_space<vmem>>, %arg4: memref<1x1x8x8xbf16, #tpu.memory_space<vmem>>, %arg5: memref<1x1x8xf32, #tpu.memory_space<vmem>>, %arg6: memref<1x1x8x8xbf16, #tpu.memory_space<vmem>>) attributes {dimension_semantics = [#tpu.dimension_semantics<parallel>, #tpu.dimension_semantics<parallel>], iteration_bounds = array<i64: 2, 4>, scalar_prefetch = 0 : i64, scratch_operands = 0 : i64, tpu.core_type = #tpu.core_type<tc>, window_params = [{transform_indices = @transform_0, window_bounds = array<i64: 1, 1, 8, 8>}, {transform_indices = @transform_1, window_bounds = array<i64: 1, 1, 8, 8>}, {transform_indices = @transform_2, window_bounds = array<i64: 1, 1, 8, 8>}, {transform_indices = @transform_3, window_bounds = array<i64: 1, 1, 8>}, {transform_indices = @transform_4, window_bounds = array<i64: 1, 1, 8, 8>}]} {
    %c0 = arith.constant 0 : index
    %c0_0 = arith.constant 0 : index
    %c0_1 = arith.constant 0 : index
    %c0_2 = arith.constant 0 : index
    %0 = vector.load %arg2[%c0, %c0_0, %c0_1, %c0_2] : memref<1x1x8x8xbf16, #tpu.memory_space<vmem>>, vector<1x1x8x8xbf16>
    %1 = vector.shape_cast %0 : vector<1x1x8x8xbf16> to vector<8x8xbf16>
    %c0_3 = arith.constant 0 : index
    %c0_4 = arith.constant 0 : index
    %c0_5 = arith.constant 0 : index
    %c0_6 = arith.constant 0 : index
    %2 = vector.load %arg3[%c0_3, %c0_4, %c0_5, %c0_6] : memref<1x1x8x8xbf16, #tpu.memory_space<vmem>>, vector<1x1x8x8xbf16>
    %3 = vector.shape_cast %2 : vector<1x1x8x8xbf16> to vector<8x8xbf16>
    %c0_7 = arith.constant 0 : index
    %c0_8 = arith.constant 0 : index
    %c0_9 = arith.constant 0 : index
    %c0_10 = arith.constant 0 : index
    %4 = vector.load %arg4[%c0_7, %c0_8, %c0_9, %c0_10] : memref<1x1x8x8xbf16, #tpu.memory_space<vmem>>, vector<1x1x8x8xbf16>
    %5 = vector.shape_cast %4 : vector<1x1x8x8xbf16> to vector<8x8xbf16>
    "tpu.trace_start"() <{level = 10 : i32, message = "qd,kd->qk"}> : () -> ()
    %cst = arith.constant dense<0.000000e+00> : vector<8x8xf32>
    %6 = tpu.matmul %1, %3, %cst {dimension_numbers = #tpu.dot_dimension_numbers<[1], [1], [0], [0], [0, 0, 1, 0], [], []>} : vector<8x8xbf16>, vector<8x8xbf16>, vector<8x8xf32> -> vector<8x8xf32>
    "tpu.trace_stop"() : () -> ()
    %cst_11 = arith.constant 0.353553385 : f32
    %7 = vector.broadcast %cst_11 : f32 to vector<8x8xf32>
    %8 = arith.mulf %6, %7 : vector<8x8xf32>
    %9 = tpu.iota {dimensions = array<i32: 0>} : vector<8x8xi32>
    %10 = tpu.iota {dimensions = array<i32: 1>} : vector<8x8xi32>
    %c0_12 = arith.constant 0 : index
    %c0_13 = arith.constant 0 : index
    %c0_14 = arith.constant 0 : index
    %11 = vector.load %arg5[%c0_12, %c0_13, %c0_14] : memref<1x1x8xf32, #tpu.memory_space<vmem>>, vector<1x1x8xf32>
    %12 = vector.shape_cast %11 : vector<1x1x8xf32> to vector<1x8xf32>
    %cst_15 = arith.constant 5.000000e-01 : f32
    %13 = vector.broadcast %cst_15 : f32 to vector<1x8xf32>
    %14 = arith.cmpf ogt, %12, %13 : vector<1x8xf32>
    %15 = arith.cmpi sle, %10, %9 : vector<8x8xi32>
    %16 = vector.broadcast %14 : vector<1x8xi1> to vector<8x8xi1>
    %17 = arith.andi %15, %16 : vector<8x8xi1>
    %cst_16 = arith.constant -1.000000e+09 : f32
    %18 = vector.broadcast %cst_16 : f32 to vector<8x8xf32>
    %19 = arith.select %17, %8, %18 : vector<8x8xi1>, vector<8x8xf32>
    %cst_17 = arith.constant dense<0xFF800000> : vector<8xf32>
    %20 = vector.multi_reduction <maximumf>, %19, %cst_17 [1] : vector<8x8xf32> to vector<8xf32>
    %21 = vector.shape_cast %20 : vector<8xf32> to vector<8x1xf32>
    %22 = vector.broadcast %21 : vector<8x1xf32> to vector<8x8xf32>
    %23 = arith.subf %19, %22 : vector<8x8xf32>
    %24 = math.exp %23 : vector<8x8xf32>
    %cst_18 = arith.constant dense<0.000000e+00> : vector<8xf32>
    %25 = vector.multi_reduction <add>, %24, %cst_18 [1] : vector<8x8xf32> to vector<8xf32>
    %26 = vector.shape_cast %25 : vector<8xf32> to vector<8x1xf32>
    %27 = tpu.reciprocal %26 {approx = true} : vector<8x1xf32> -> vector<8x1xf32>
    %28 = vector.broadcast %27 : vector<8x1xf32> to vector<8x8xf32>
    %29 = arith.mulf %24, %28 : vector<8x8xf32>
    %30 = arith.truncf %29 : vector<8x8xf32> to vector<8x8xbf16>
    %cst_19 = arith.constant dense<0.000000e+00> : vector<8x8xf32>
    %31 = tpu.matmul %30, %5, %cst_19 {dimension_numbers = #tpu.dot_dimension_numbers<[1], [0], [0], [1], [0, 0, 1, 1], [], []>} : vector<8x8xbf16>, vector<8x8xbf16>, vector<8x8xf32> -> vector<8x8xf32>
    %32 = arith.truncf %31 : vector<8x8xf32> to vector<8x8xbf16>
    %c0_20 = arith.constant 0 : index
    %c0_21 = arith.constant 0 : index
    %c0_22 = arith.constant 0 : index
    %c0_23 = arith.constant 0 : index
    %33 = vector.load %arg6[%c0_20, %c0_21, %c0_22, %c0_23] : memref<1x1x8x8xbf16, #tpu.memory_space<vmem>>, vector<1x1x8x8xbf16>
    %34 = vector.shape_cast %33 : vector<1x1x8x8xbf16> to vector<8x8xbf16>
    %35 = vector.shape_cast %32 : vector<8x8xbf16> to vector<1x1x8x8xbf16>
    tpu.vector_store %arg6[%c0_20, %c0_21, %c0_22, %c0_23], %35 {strides = array<i32>} : memref<1x1x8x8xbf16, #tpu.memory_space<vmem>>, vector<1x1x8x8xbf16>,
    return
  }
  func.func @transform_0(%arg0: i32, %arg1: i32) -> (i32, i32, i32, i32) {
    %c0_i32 = arith.constant 0 : i32
    %c0_i32_0 = arith.constant 0 : i32
    %c0_i32_1 = arith.constant 0 : i32
    return %arg0, %arg1, %c0_i32, %c0_i32_0 : i32, i32, i32, i32
  }
  func.func @transform_1(%arg0: i32, %arg1: i32) -> (i32, i32, i32, i32) {
    %c0_i32 = arith.constant 0 : i32
    %c0_i32_0 = arith.constant 0 : i32
    %c0_i32_1 = arith.constant 0 : i32
    return %arg0, %arg1, %c0_i32, %c0_i32_0 : i32, i32, i32, i32
  }
  func.func @transform_2(%arg0: i32, %arg1: i32) -> (i32, i32, i32, i32) {
    %c0_i32 = arith.constant 0 : i32
    %c0_i32_0 = arith.constant 0 : i32
    %c0_i32_1 = arith.constant 0 : i32
    return %arg0, %arg1, %c0_i32, %c0_i32_0 : i32, i32, i32, i32
  }
  func.func @transform_3(%arg0: i32, %arg1: i32) -> (i32, i32, i32) {
    %c0_i32 = arith.constant 0 : i32
    %c0_i32_0 = arith.constant 0 : i32
    %c0_i32_1 = arith.constant 0 : i32
    return %arg0, %c0_i32, %c0_i32_0 : i32, i32, i32
  }
  func.func @transform_4(%arg0: i32, %arg1: i32) -> (i32, i32, i32, i32) {
    %c0_i32 = arith.constant 0 : i32
    %c0_i32_0 = arith.constant 0 : i32
    %c0_i32_1 = arith.constant 0 : i32
    return %arg0, %arg1, %c0_i32, %c0_i32_0 : i32, i32, i32, i32
  }
}

module attributes {stable_mosaic.version = 11 : i64} {
  func.func @linear_residual_layernorm_kernel(%arg0: i32, %arg1: memref<16x32xbf16, #tpu.memory_space<vmem>>, %arg2: memref<32x32xbf16, #tpu.memory_space<vmem>>, %arg3: memref<1x32xf32, #tpu.memory_space<vmem>>, %arg4: memref<16x32xbf16, #tpu.memory_space<vmem>>, %arg5: memref<1x32xf32, #tpu.memory_space<vmem>>, %arg6: memref<1x32xf32, #tpu.memory_space<vmem>>, %arg7: memref<16x32xbf16, #tpu.memory_space<vmem>>) attributes {dimension_semantics = [#tpu.dimension_semantics<parallel>], iteration_bounds = array<i64: 1>, scalar_prefetch = 0 : i64, scratch_operands = 0 : i64, tpu.core_type = #tpu.core_type<tc>, window_params = [{transform_indices = @transform_0, window_bounds = array<i64: 16, 32>}, {pipeline_mode = #tpu.pipeline_mode<synchronous>, transform_indices = @transform_1, window_bounds = array<i64: 32, 32>}, {pipeline_mode = #tpu.pipeline_mode<synchronous>, transform_indices = @transform_2, window_bounds = array<i64: 1, 32>}, {transform_indices = @transform_3, window_bounds = array<i64: 16, 32>}, {pipeline_mode = #tpu.pipeline_mode<synchronous>, transform_indices = @transform_4, window_bounds = array<i64: 1, 32>}, {pipeline_mode = #tpu.pipeline_mode<synchronous>, transform_indices = @transform_5, window_bounds = array<i64: 1, 32>}, {transform_indices = @transform_6, window_bounds = array<i64: 16, 32>}]} {
    %c0 = arith.constant 0 : index
    %c0_0 = arith.constant 0 : index
    %0 = vector.load %arg1[%c0, %c0_0] : memref<16x32xbf16, #tpu.memory_space<vmem>>, vector<16x32xbf16>
    %c0_1 = arith.constant 0 : index
    %c0_2 = arith.constant 0 : index
    %1 = vector.load %arg2[%c0_1, %c0_2] : memref<32x32xbf16, #tpu.memory_space<vmem>>, vector<32x32xbf16>
    %cst = arith.constant dense<0.000000e+00> : vector<16x32xf32>
    %2 = tpu.matmul %0, %1, %cst {dimension_numbers = #tpu.dot_dimension_numbers<[1], [0], [0], [1], [0, 0, 1, 1], [], []>} : vector<16x32xbf16>, vector<32x32xbf16>, vector<16x32xf32> -> vector<16x32xf32>
    %c0_3 = arith.constant 0 : index
    %c0_4 = arith.constant 0 : index
    %3 = vector.load %arg3[%c0_3, %c0_4] : memref<1x32xf32, #tpu.memory_space<vmem>>, vector<1x32xf32>
    %4 = vector.broadcast %3 : vector<1x32xf32> to vector<16x32xf32>
    %5 = arith.addf %2, %4 : vector<16x32xf32>
    %c0_5 = arith.constant 0 : index
    %c0_6 = arith.constant 0 : index
    %6 = vector.load %arg4[%c0_5, %c0_6] : memref<16x32xbf16, #tpu.memory_space<vmem>>, vector<16x32xbf16>
    %7 = arith.extf %6 : vector<16x32xbf16> to vector<16x32xf32>
    %8 = arith.addf %5, %7 : vector<16x32xf32>
    %cst_7 = arith.constant dense<0.000000e+00> : vector<16xf32>
    %9 = vector.multi_reduction <add>, %8, %cst_7 [1] : vector<16x32xf32> to vector<16xf32>
    %10 = vector.shape_cast %9 : vector<16xf32> to vector<16x1xf32>
    %cst_8 = arith.constant 3.200000e+01 : f32
    %11 = vector.broadcast %cst_8 : f32 to vector<16x1xf32>
    %12 = arith.divf %10, %11 : vector<16x1xf32>
    %13 = vector.broadcast %12 : vector<16x1xf32> to vector<16x32xf32>
    %14 = arith.subf %8, %13 : vector<16x32xf32>
    %15 = arith.mulf %14, %14 : vector<16x32xf32>
    %cst_9 = arith.constant dense<0.000000e+00> : vector<16xf32>
    %16 = vector.multi_reduction <add>, %15, %cst_9 [1] : vector<16x32xf32> to vector<16xf32>
    %17 = vector.shape_cast %16 : vector<16xf32> to vector<16x1xf32>
    %cst_10 = arith.constant 3.200000e+01 : f32
    %18 = vector.broadcast %cst_10 : f32 to vector<16x1xf32>
    %19 = arith.divf %17, %18 : vector<16x1xf32>
    %20 = vector.broadcast %12 : vector<16x1xf32> to vector<16x32xf32>
    %21 = arith.subf %8, %20 : vector<16x32xf32>
    %cst_11 = arith.constant 9.99999996E-13 : f32
    %22 = vector.broadcast %cst_11 : f32 to vector<16x1xf32>
    %23 = arith.addf %19, %22 : vector<16x1xf32>
    %24 = math.rsqrt %23 : vector<16x1xf32>
    %25 = vector.broadcast %24 : vector<16x1xf32> to vector<16x32xf32>
    %26 = arith.mulf %21, %25 : vector<16x32xf32>
    %c0_12 = arith.constant 0 : index
    %c0_13 = arith.constant 0 : index
    %27 = vector.load %arg5[%c0_12, %c0_13] : memref<1x32xf32, #tpu.memory_space<vmem>>, vector<1x32xf32>
    %28 = vector.broadcast %27 : vector<1x32xf32> to vector<16x32xf32>
    %29 = arith.mulf %26, %28 : vector<16x32xf32>
    %c0_14 = arith.constant 0 : index
    %c0_15 = arith.constant 0 : index
    %30 = vector.load %arg6[%c0_14, %c0_15] : memref<1x32xf32, #tpu.memory_space<vmem>>, vector<1x32xf32>
    %31 = vector.broadcast %30 : vector<1x32xf32> to vector<16x32xf32>
    %32 = arith.addf %29, %31 : vector<16x32xf32>
    %33 = arith.truncf %32 : vector<16x32xf32> to vector<16x32xbf16>
    %c0_16 = arith.constant 0 : index
    %c0_17 = arith.constant 0 : index
    %34 = vector.load %arg7[%c0_16, %c0_17] : memref<16x32xbf16, #tpu.memory_space<vmem>>, vector<16x32xbf16>
    tpu.vector_store %arg7[%c0_16, %c0_17], %33 {strides = array<i32>} : memref<16x32xbf16, #tpu.memory_space<vmem>>, vector<16x32xbf16>,
    return
  }
  func.func @transform_0(%arg0: i32) -> (i32, i32) {
    %c0_i32 = arith.constant 0 : i32
    %c0_i32_0 = arith.constant 0 : i32
    return %arg0, %c0_i32 : i32, i32
  }
  func.func @transform_1(%arg0: i32) -> (i32, i32) {
    %c0_i32 = arith.constant 0 : i32
    %c0_i32_0 = arith.constant 0 : i32
    %c0_i32_1 = arith.constant 0 : i32
    return %c0_i32, %c0_i32_0 : i32, i32
  }
  func.func @transform_2(%arg0: i32) -> (i32, i32) {
    %c0_i32 = arith.constant 0 : i32
    %c0_i32_0 = arith.constant 0 : i32
    %c0_i32_1 = arith.constant 0 : i32
    return %c0_i32, %c0_i32_0 : i32, i32
  }
  func.func @transform_3(%arg0: i32) -> (i32, i32) {
    %c0_i32 = arith.constant 0 : i32
    %c0_i32_0 = arith.constant 0 : i32
    return %arg0, %c0_i32 : i32, i32
  }
  func.func @transform_4(%arg0: i32) -> (i32, i32) {
    %c0_i32 = arith.constant 0 : i32
    %c0_i32_0 = arith.constant 0 : i32
    %c0_i32_1 = arith.constant 0 : i32
    return %c0_i32, %c0_i32_0 : i32, i32
  }
  func.func @transform_5(%arg0: i32) -> (i32, i32) {
    %c0_i32 = arith.constant 0 : i32
    %c0_i32_0 = arith.constant 0 : i32
    %c0_i32_1 = arith.constant 0 : i32
    return %c0_i32, %c0_i32_0 : i32, i32
  }
  func.func @transform_6(%arg0: i32) -> (i32, i32) {
    %c0_i32 = arith.constant 0 : i32
    %c0_i32_0 = arith.constant 0 : i32
    return %arg0, %c0_i32 : i32, i32
  }
}

module attributes {stable_mosaic.version = 11 : i64} {
  func.func @linear_gelu_kernel(%arg0: i32, %arg1: i32, %arg2: memref<16x32xbf16, #tpu.memory_space<vmem>>, %arg3: memref<32x64xbf16, #tpu.memory_space<vmem>>, %arg4: memref<1x64xf32, #tpu.memory_space<vmem>>, %arg5: memref<16x64xbf16, #tpu.memory_space<vmem>>) attributes {dimension_semantics = [#tpu.dimension_semantics<parallel>, #tpu.dimension_semantics<parallel>], iteration_bounds = array<i64: 1, 1>, scalar_prefetch = 0 : i64, scratch_operands = 0 : i64, tpu.core_type = #tpu.core_type<tc>, window_params = [{transform_indices = @transform_0, window_bounds = array<i64: 16, 32>}, {transform_indices = @transform_1, window_bounds = array<i64: 32, 64>}, {transform_indices = @transform_2, window_bounds = array<i64: 1, 64>}, {transform_indices = @transform_3, window_bounds = array<i64: 16, 64>}]} {
    %c0 = arith.constant 0 : index
    %c0_0 = arith.constant 0 : index
    %0 = vector.load %arg2[%c0, %c0_0] : memref<16x32xbf16, #tpu.memory_space<vmem>>, vector<16x32xbf16>
    %c0_1 = arith.constant 0 : index
    %c0_2 = arith.constant 0 : index
    %1 = vector.load %arg3[%c0_1, %c0_2] : memref<32x64xbf16, #tpu.memory_space<vmem>>, vector<32x64xbf16>
    %cst = arith.constant dense<0.000000e+00> : vector<16x64xf32>
    %2 = tpu.matmul %0, %1, %cst {dimension_numbers = #tpu.dot_dimension_numbers<[1], [0], [0], [1], [0, 0, 1, 1], [], []>} : vector<16x32xbf16>, vector<32x64xbf16>, vector<16x64xf32> -> vector<16x64xf32>
    %c0_3 = arith.constant 0 : index
    %c0_4 = arith.constant 0 : index
    %3 = vector.load %arg4[%c0_3, %c0_4] : memref<1x64xf32, #tpu.memory_space<vmem>>, vector<1x64xf32>
    %4 = vector.broadcast %3 : vector<1x64xf32> to vector<16x64xf32>
    %5 = arith.addf %2, %4 : vector<16x64xf32>
    %cst_5 = arith.constant 5.000000e-01 : f32
    %6 = vector.broadcast %cst_5 : f32 to vector<16x64xf32>
    %7 = arith.mulf %6, %5 : vector<16x64xf32>
    %cst_6 = arith.constant 4.471500e-02 : f32
    %8 = vector.broadcast %cst_6 : f32 to vector<16x64xf32>
    %9 = arith.mulf %8, %5 : vector<16x64xf32>
    %10 = arith.mulf %9, %5 : vector<16x64xf32>
    %11 = arith.mulf %10, %5 : vector<16x64xf32>
    %12 = arith.addf %5, %11 : vector<16x64xf32>
    %cst_7 = arith.constant 0.797884583 : f32
    %13 = vector.broadcast %cst_7 : f32 to vector<16x64xf32>
    %14 = arith.mulf %13, %12 : vector<16x64xf32>
    %15 = math.tanh %14 : vector<16x64xf32>
    %cst_8 = arith.constant 1.000000e+00 : f32
    %16 = vector.broadcast %cst_8 : f32 to vector<16x64xf32>
    %17 = arith.addf %16, %15 : vector<16x64xf32>
    %18 = arith.mulf %7, %17 : vector<16x64xf32>
    %19 = arith.truncf %18 : vector<16x64xf32> to vector<16x64xbf16>
    %c0_9 = arith.constant 0 : index
    %c0_10 = arith.constant 0 : index
    %20 = vector.load %arg5[%c0_9, %c0_10] : memref<16x64xbf16, #tpu.memory_space<vmem>>, vector<16x64xbf16>
    tpu.vector_store %arg5[%c0_9, %c0_10], %19 {strides = array<i32>} : memref<16x64xbf16, #tpu.memory_space<vmem>>, vector<16x64xbf16>,
    return
  }
  func.func @transform_0(%arg0: i32, %arg1: i32) -> (i32, i32) {
    %c0_i32 = arith.constant 0 : i32
    %c0_i32_0 = arith.constant 0 : i32
    return %arg1, %c0_i32 : i32, i32
  }
  func.func @transform_1(%arg0: i32, %arg1: i32) -> (i32, i32) {
    %c0_i32 = arith.constant 0 : i32
    %c0_i32_0 = arith.constant 0 : i32
    return %c0_i32, %arg0 : i32, i32
  }
  func.func @transform_2(%arg0: i32, %arg1: i32) -> (i32, i32) {
    %c0_i32 = arith.constant 0 : i32
    %c0_i32_0 = arith.constant 0 : i32
    return %c0_i32, %arg0 : i32, i32
  }
  func.func @transform_3(%arg0: i32, %arg1: i32) -> (i32, i32) {
    %c0_i32 = arith.constant 0 : i32
    return %arg1, %arg0 : i32, i32
  }
}

module attributes {stable_mosaic.version = 11 : i64} {
  func.func @classify_lse_kernel(%arg0: i32, %arg1: i32, %arg2: memref<16x32xbf16, #tpu.memory_space<vmem>>, %arg3: memref<32x128xbf16, #tpu.memory_space<vmem>>, %arg4: memref<1x128xf32, #tpu.memory_space<vmem>>, %arg5: memref<16x1xf32, #tpu.memory_space<vmem>>, %arg6: memref<16x1xf32, #tpu.memory_space<vmem>>, %arg7: memref<16x1xf32, #tpu.memory_space<vmem>>) attributes {dimension_semantics = [#tpu.dimension_semantics<parallel>, #tpu.dimension_semantics<arbitrary>], iteration_bounds = array<i64: 1, 1>, scalar_prefetch = 0 : i64, scratch_operands = 2 : i64, tpu.core_type = #tpu.core_type<tc>, window_params = [{transform_indices = @transform_0, window_bounds = array<i64: 16, 32>}, {transform_indices = @transform_1, window_bounds = array<i64: 32, 128>}, {transform_indices = @transform_2, window_bounds = array<i64: 1, 128>}, {transform_indices = @transform_3, window_bounds = array<i64: 16, 1>}]} {
    %c0_i32 = arith.constant 0 : i32
    %0 = arith.cmpi eq, %arg1, %c0_i32 : i32
    %1 = arith.extui %0 : i1 to i32
    %c0_i32_0 = arith.constant 0 : i32
    %2 = arith.cmpi ne, %1, %c0_i32_0 : i32
    scf.if %2 {
      %cst_20 = arith.constant 0xFF800000 : f32
      %29 = vector.broadcast %cst_20 : f32 to vector<16x1xf32>
      %c0_21 = arith.constant 0 : index
      %c0_22 = arith.constant 0 : index
      %30 = vector.load %arg6[%c0_21, %c0_22] : memref<16x1xf32, #tpu.memory_space<vmem>>, vector<16x1xf32>
      tpu.vector_store %arg6[%c0_21, %c0_22], %29 {strides = array<i32>} : memref<16x1xf32, #tpu.memory_space<vmem>>, vector<16x1xf32>,
      %cst_23 = arith.constant 0.000000e+00 : f32
      %31 = vector.broadcast %cst_23 : f32 to vector<16x1xf32>
      %c0_24 = arith.constant 0 : index
      %c0_25 = arith.constant 0 : index
      %32 = vector.load %arg7[%c0_24, %c0_25] : memref<16x1xf32, #tpu.memory_space<vmem>>, vector<16x1xf32>
      tpu.vector_store %arg7[%c0_24, %c0_25], %31 {strides = array<i32>} : memref<16x1xf32, #tpu.memory_space<vmem>>, vector<16x1xf32>,
    } else {
    }
    %c0 = arith.constant 0 : index
    %c0_1 = arith.constant 0 : index
    %3 = vector.load %arg2[%c0, %c0_1] : memref<16x32xbf16, #tpu.memory_space<vmem>>, vector<16x32xbf16>
    %c0_2 = arith.constant 0 : index
    %c0_3 = arith.constant 0 : index
    %4 = vector.load %arg3[%c0_2, %c0_3] : memref<32x128xbf16, #tpu.memory_space<vmem>>, vector<32x128xbf16>
    %cst = arith.constant dense<0.000000e+00> : vector<16x128xf32>
    %5 = tpu.matmul %3, %4, %cst {dimension_numbers = #tpu.dot_dimension_numbers<[1], [0], [0], [1], [0, 0, 1, 1], [], []>} : vector<16x32xbf16>, vector<32x128xbf16>, vector<16x128xf32> -> vector<16x128xf32>
    %c0_4 = arith.constant 0 : index
    %c0_5 = arith.constant 0 : index
    %6 = vector.load %arg4[%c0_4, %c0_5] : memref<1x128xf32, #tpu.memory_space<vmem>>, vector<1x128xf32>
    %7 = vector.broadcast %6 : vector<1x128xf32> to vector<16x128xf32>
    %8 = arith.addf %5, %7 : vector<16x128xf32>
    %c0_6 = arith.constant 0 : index
    %c0_7 = arith.constant 0 : index
    %9 = vector.load %arg6[%c0_6, %c0_7] : memref<16x1xf32, #tpu.memory_space<vmem>>, vector<16x1xf32>
    %cst_8 = arith.constant dense<0xFF800000> : vector<16xf32>
    %10 = vector.multi_reduction <maximumf>, %8, %cst_8 [1] : vector<16x128xf32> to vector<16xf32>
    %11 = vector.shape_cast %10 : vector<16xf32> to vector<16x1xf32>
    %12 = arith.maximumf %9, %11 : vector<16x1xf32>
    %c0_9 = arith.constant 0 : index
    %c0_10 = arith.constant 0 : index
    %13 = vector.load %arg7[%c0_9, %c0_10] : memref<16x1xf32, #tpu.memory_space<vmem>>, vector<16x1xf32>
    %c0_11 = arith.constant 0 : index
    %c0_12 = arith.constant 0 : index
    %14 = vector.load %arg6[%c0_11, %c0_12] : memref<16x1xf32, #tpu.memory_space<vmem>>, vector<16x1xf32>
    %15 = arith.subf %14, %12 : vector<16x1xf32>
    %16 = math.exp %15 : vector<16x1xf32>
    %17 = arith.mulf %13, %16 : vector<16x1xf32>
    %18 = vector.broadcast %12 : vector<16x1xf32> to vector<16x128xf32>
    %19 = arith.subf %8, %18 : vector<16x128xf32>
    %20 = math.exp %19 : vector<16x128xf32>
    %cst_13 = arith.constant dense<0.000000e+00> : vector<16xf32>
    %21 = vector.multi_reduction <add>, %20, %cst_13 [1] : vector<16x128xf32> to vector<16xf32>
    %22 = vector.shape_cast %21 : vector<16xf32> to vector<16x1xf32>
    %23 = arith.addf %17, %22 : vector<16x1xf32>
    %c0_14 = arith.constant 0 : index
    %c0_15 = arith.constant 0 : index
    %24 = vector.load %arg7[%c0_14, %c0_15] : memref<16x1xf32, #tpu.memory_space<vmem>>, vector<16x1xf32>
    tpu.vector_store %arg7[%c0_14, %c0_15], %23 {strides = array<i32>} : memref<16x1xf32, #tpu.memory_space<vmem>>, vector<16x1xf32>,
    %c0_16 = arith.constant 0 : index
    %c0_17 = arith.constant 0 : index
    %25 = vector.load %arg6[%c0_16, %c0_17] : memref<16x1xf32, #tpu.memory_space<vmem>>, vector<16x1xf32>
    tpu.vector_store %arg6[%c0_16, %c0_17], %12 {strides = array<i32>} : memref<16x1xf32, #tpu.memory_space<vmem>>, vector<16x1xf32>,
    %c0_i32_18 = arith.constant 0 : i32
    %26 = arith.cmpi eq, %arg1, %c0_i32_18 : i32
    %27 = arith.extui %26 : i1 to i32
    %c0_i32_19 = arith.constant 0 : i32
    %28 = arith.cmpi ne, %27, %c0_i32_19 : i32
    scf.if %28 {
      %c0_20 = arith.constant 0 : index
      %c0_21 = arith.constant 0 : index
      %29 = vector.load %arg6[%c0_20, %c0_21] : memref<16x1xf32, #tpu.memory_space<vmem>>, vector<16x1xf32>
      %c0_22 = arith.constant 0 : index
      %c0_23 = arith.constant 0 : index
      %30 = vector.load %arg7[%c0_22, %c0_23] : memref<16x1xf32, #tpu.memory_space<vmem>>, vector<16x1xf32>
      %31 = math.log %30 : vector<16x1xf32>
      %32 = arith.addf %29, %31 : vector<16x1xf32>
      %c0_24 = arith.constant 0 : index
      %c0_25 = arith.constant 0 : index
      %33 = vector.load %arg5[%c0_24, %c0_25] : memref<16x1xf32, #tpu.memory_space<vmem>>, vector<16x1xf32>
      tpu.vector_store %arg5[%c0_24, %c0_25], %32 {strides = array<i32>} : memref<16x1xf32, #tpu.memory_space<vmem>>, vector<16x1xf32>,
    } else {
    }
    return
  }
  func.func @transform_0(%arg0: i32, %arg1: i32) -> (i32, i32) {
    %c0_i32 = arith.constant 0 : i32
    %c0_i32_0 = arith.constant 0 : i32
    return %arg0, %c0_i32 : i32, i32
  }
  func.func @transform_1(%arg0: i32, %arg1: i32) -> (i32, i32) {
    %c0_i32 = arith.constant 0 : i32
    %c0_i32_0 = arith.constant 0 : i32
    return %c0_i32, %arg1 : i32, i32
  }
  func.func @transform_2(%arg0: i32, %arg1: i32) -> (i32, i32) {
    %c0_i32 = arith.constant 0 : i32
    %c0_i32_0 = arith.constant 0 : i32
    return %c0_i32, %arg1 : i32, i32
  }
  func.func @transform_3(%arg0: i32, %arg1: i32) -> (i32, i32) {
    %c0_i32 = arith.constant 0 : i32
    %c0_i32_0 = arith.constant 0 : i32
    return %arg0, %c0_i32 : i32, i32
  }
}

module attributes {stable_mosaic.version = 11 : i64} {
  func.func @linear_residual_layernorm_kernel(%arg0: i32, %arg1: memref<16x64xbf16, #tpu.memory_space<vmem>>, %arg2: memref<64x32xbf16, #tpu.memory_space<vmem>>, %arg3: memref<1x32xf32, #tpu.memory_space<vmem>>, %arg4: memref<16x32xbf16, #tpu.memory_space<vmem>>, %arg5: memref<1x32xf32, #tpu.memory_space<vmem>>, %arg6: memref<1x32xf32, #tpu.memory_space<vmem>>, %arg7: memref<16x32xbf16, #tpu.memory_space<vmem>>) attributes {dimension_semantics = [#tpu.dimension_semantics<parallel>], iteration_bounds = array<i64: 1>, scalar_prefetch = 0 : i64, scratch_operands = 0 : i64, tpu.core_type = #tpu.core_type<tc>, window_params = [{transform_indices = @transform_0, window_bounds = array<i64: 16, 64>}, {pipeline_mode = #tpu.pipeline_mode<synchronous>, transform_indices = @transform_1, window_bounds = array<i64: 64, 32>}, {pipeline_mode = #tpu.pipeline_mode<synchronous>, transform_indices = @transform_2, window_bounds = array<i64: 1, 32>}, {transform_indices = @transform_3, window_bounds = array<i64: 16, 32>}, {pipeline_mode = #tpu.pipeline_mode<synchronous>, transform_indices = @transform_4, window_bounds = array<i64: 1, 32>}, {pipeline_mode = #tpu.pipeline_mode<synchronous>, transform_indices = @transform_5, window_bounds = array<i64: 1, 32>}, {transform_indices = @transform_6, window_bounds = array<i64: 16, 32>}]} {
    %c0 = arith.constant 0 : index
    %c0_0 = arith.constant 0 : index
    %0 = vector.load %arg1[%c0, %c0_0] : memref<16x64xbf16, #tpu.memory_space<vmem>>, vector<16x64xbf16>
    %c0_1 = arith.constant 0 : index
    %c0_2 = arith.constant 0 : index
    %1 = vector.load %arg2[%c0_1, %c0_2] : memref<64x32xbf16, #tpu.memory_space<vmem>>, vector<64x32xbf16>
    %cst = arith.constant dense<0.000000e+00> : vector<16x32xf32>
    %2 = tpu.matmul %0, %1, %cst {dimension_numbers = #tpu.dot_dimension_numbers<[1], [0], [0], [1], [0, 0, 1, 1], [], []>} : vector<16x64xbf16>, vector<64x32xbf16>, vector<16x32xf32> -> vector<16x32xf32>
    %c0_3 = arith.constant 0 : index
    %c0_4 = arith.constant 0 : index
    %3 = vector.load %arg3[%c0_3, %c0_4] : memref<1x32xf32, #tpu.memory_space<vmem>>, vector<1x32xf32>
    %4 = vector.broadcast %3 : vector<1x32xf32> to vector<16x32xf32>
    %5 = arith.addf %2, %4 : vector<16x32xf32>
    %c0_5 = arith.constant 0 : index
    %c0_6 = arith.constant 0 : index
    %6 = vector.load %arg4[%c0_5, %c0_6] : memref<16x32xbf16, #tpu.memory_space<vmem>>, vector<16x32xbf16>
    %7 = arith.extf %6 : vector<16x32xbf16> to vector<16x32xf32>
    %8 = arith.addf %5, %7 : vector<16x32xf32>
    %cst_7 = arith.constant dense<0.000000e+00> : vector<16xf32>
    %9 = vector.multi_reduction <add>, %8, %cst_7 [1] : vector<16x32xf32> to vector<16xf32>
    %10 = vector.shape_cast %9 : vector<16xf32> to vector<16x1xf32>
    %cst_8 = arith.constant 3.200000e+01 : f32
    %11 = vector.broadcast %cst_8 : f32 to vector<16x1xf32>
    %12 = arith.divf %10, %11 : vector<16x1xf32>
    %13 = vector.broadcast %12 : vector<16x1xf32> to vector<16x32xf32>
    %14 = arith.subf %8, %13 : vector<16x32xf32>
    %15 = arith.mulf %14, %14 : vector<16x32xf32>
    %cst_9 = arith.constant dense<0.000000e+00> : vector<16xf32>
    %16 = vector.multi_reduction <add>, %15, %cst_9 [1] : vector<16x32xf32> to vector<16xf32>
    %17 = vector.shape_cast %16 : vector<16xf32> to vector<16x1xf32>
    %cst_10 = arith.constant 3.200000e+01 : f32
    %18 = vector.broadcast %cst_10 : f32 to vector<16x1xf32>
    %19 = arith.divf %17, %18 : vector<16x1xf32>
    %20 = vector.broadcast %12 : vector<16x1xf32> to vector<16x32xf32>
    %21 = arith.subf %8, %20 : vector<16x32xf32>
    %cst_11 = arith.constant 9.99999996E-13 : f32
    %22 = vector.broadcast %cst_11 : f32 to vector<16x1xf32>
    %23 = arith.addf %19, %22 : vector<16x1xf32>
    %24 = math.rsqrt %23 : vector<16x1xf32>
    %25 = vector.broadcast %24 : vector<16x1xf32> to vector<16x32xf32>
    %26 = arith.mulf %21, %25 : vector<16x32xf32>
    %c0_12 = arith.constant 0 : index
    %c0_13 = arith.constant 0 : index
    %27 = vector.load %arg5[%c0_12, %c0_13] : memref<1x32xf32, #tpu.memory_space<vmem>>, vector<1x32xf32>
    %28 = vector.broadcast %27 : vector<1x32xf32> to vector<16x32xf32>
    %29 = arith.mulf %26, %28 : vector<16x32xf32>
    %c0_14 = arith.constant 0 : index
    %c0_15 = arith.constant 0 : index
    %30 = vector.load %arg6[%c0_14, %c0_15] : memref<1x32xf32, #tpu.memory_space<vmem>>, vector<1x32xf32>
    %31 = vector.broadcast %30 : vector<1x32xf32> to vector<16x32xf32>
    %32 = arith.addf %29, %31 : vector<16x32xf32>
    %33 = arith.truncf %32 : vector<16x32xf32> to vector<16x32xbf16>
    %c0_16 = arith.constant 0 : index
    %c0_17 = arith.constant 0 : index
    %34 = vector.load %arg7[%c0_16, %c0_17] : memref<16x32xbf16, #tpu.memory_space<vmem>>, vector<16x32xbf16>
    tpu.vector_store %arg7[%c0_16, %c0_17], %33 {strides = array<i32>} : memref<16x32xbf16, #tpu.memory_space<vmem>>, vector<16x32xbf16>,
    return
  }
  func.func @transform_0(%arg0: i32) -> (i32, i32) {
    %c0_i32 = arith.constant 0 : i32
    %c0_i32_0 = arith.constant 0 : i32
    return %arg0, %c0_i32 : i32, i32
  }
  func.func @transform_1(%arg0: i32) -> (i32, i32) {
    %c0_i32 = arith.constant 0 : i32
    %c0_i32_0 = arith.constant 0 : i32
    %c0_i32_1 = arith.constant 0 : i32
    return %c0_i32, %c0_i32_0 : i32, i32
  }
  func.func @transform_2(%arg0: i32) -> (i32, i32) {
    %c0_i32 = arith.constant 0 : i32
    %c0_i32_0 = arith.constant 0 : i32
    %c0_i32_1 = arith.constant 0 : i32
    return %c0_i32, %c0_i32_0 : i32, i32
  }
  func.func @transform_3(%arg0: i32) -> (i32, i32) {
    %c0_i32 = arith.constant 0 : i32
    %c0_i32_0 = arith.constant 0 : i32
    return %arg0, %c0_i32 : i32, i32
  }
  func.func @transform_4(%arg0: i32) -> (i32, i32) {
    %c0_i32 = arith.constant 0 : i32
    %c0_i32_0 = arith.constant 0 : i32
    %c0_i32_1 = arith.constant 0 : i32
    return %c0_i32, %c0_i32_0 : i32, i32
  }
  func.func @transform_5(%arg0: i32) -> (i32, i32) {
    %c0_i32 = arith.constant 0 : i32
    %c0_i32_0 = arith.constant 0 : i32
    %c0_i32_1 = arith.constant 0 : i32
    return %c0_i32, %c0_i32_0 : i32, i32
  }
  func.func @transform_6(%arg0: i32) -> (i32, i32) {
    %c0_i32 = arith.constant 0 : i32
    %c0_i32_0 = arith.constant 0 : i32
    return %arg0, %c0_i32 : i32, i32
  }
}

module attributes {stable_mosaic.version = 11 : i64} {
  func.func @classify_probs_kernel(%arg0: i32, %arg1: i32, %arg2: memref<16x32xbf16, #tpu.memory_space<vmem>>, %arg3: memref<32x128xbf16, #tpu.memory_space<vmem>>, %arg4: memref<1x128xf32, #tpu.memory_space<vmem>>, %arg5: memref<16x1xf32, #tpu.memory_space<vmem>>, %arg6: memref<16x128xbf16, #tpu.memory_space<vmem>>) attributes {dimension_semantics = [#tpu.dimension_semantics<parallel>, #tpu.dimension_semantics<parallel>], iteration_bounds = array<i64: 1, 1>, scalar_prefetch = 0 : i64, scratch_operands = 0 : i64, tpu.core_type = #tpu.core_type<tc>, window_params = [{transform_indices = @transform_0, window_bounds = array<i64: 16, 32>}, {transform_indices = @transform_1, window_bounds = array<i64: 32, 128>}, {transform_indices = @transform_2, window_bounds = array<i64: 1, 128>}, {transform_indices = @transform_3, window_bounds = array<i64: 16, 1>}, {transform_indices = @transform_4, window_bounds = array<i64: 16, 128>}]} {
    %c0 = arith.constant 0 : index
    %c0_0 = arith.constant 0 : index
    %0 = vector.load %arg2[%c0, %c0_0] : memref<16x32xbf16, #tpu.memory_space<vmem>>, vector<16x32xbf16>
    %c0_1 = arith.constant 0 : index
    %c0_2 = arith.constant 0 : index
    %1 = vector.load %arg3[%c0_1, %c0_2] : memref<32x128xbf16, #tpu.memory_space<vmem>>, vector<32x128xbf16>
    %cst = arith.constant dense<0.000000e+00> : vector<16x128xf32>
    %2 = tpu.matmul %0, %1, %cst {dimension_numbers = #tpu.dot_dimension_numbers<[1], [0], [0], [1], [0, 0, 1, 1], [], []>} : vector<16x32xbf16>, vector<32x128xbf16>, vector<16x128xf32> -> vector<16x128xf32>
    %c0_3 = arith.constant 0 : index
    %c0_4 = arith.constant 0 : index
    %3 = vector.load %arg4[%c0_3, %c0_4] : memref<1x128xf32, #tpu.memory_space<vmem>>, vector<1x128xf32>
    %4 = vector.broadcast %3 : vector<1x128xf32> to vector<16x128xf32>
    %5 = arith.addf %2, %4 : vector<16x128xf32>
    %c0_5 = arith.constant 0 : index
    %c0_6 = arith.constant 0 : index
    %6 = vector.load %arg5[%c0_5, %c0_6] : memref<16x1xf32, #tpu.memory_space<vmem>>, vector<16x1xf32>
    %7 = vector.broadcast %6 : vector<16x1xf32> to vector<16x128xf32>
    %8 = arith.subf %5, %7 : vector<16x128xf32>
    %9 = math.exp %8 : vector<16x128xf32>
    %10 = arith.truncf %9 : vector<16x128xf32> to vector<16x128xbf16>
    %c0_7 = arith.constant 0 : index
    %c0_8 = arith.constant 0 : index
    %11 = vector.load %arg6[%c0_7, %c0_8] : memref<16x128xbf16, #tpu.memory_space<vmem>>, vector<16x128xbf16>
    tpu.vector_store %arg6[%c0_7, %c0_8], %10 {strides = array<i32>} : memref<16x128xbf16, #tpu.memory_space<vmem>>, vector<16x128xbf16>,
    return
  }
  func.func @transform_0(%arg0: i32, %arg1: i32) -> (i32, i32) {
    %c0_i32 = arith.constant 0 : i32
    %c0_i32_0 = arith.constant 0 : i32
    return %arg1, %c0_i32 : i32, i32
  }
  func.func @transform_1(%arg0: i32, %arg1: i32) -> (i32, i32) {
    %c0_i32 = arith.constant 0 : i32
    %c0_i32_0 = arith.constant 0 : i32
    return %c0_i32, %arg0 : i32, i32
  }
  func.func @transform_2(%arg0: i32, %arg1: i32) -> (i32, i32) {
    %c0_i32 = arith.constant 0 : i32
    %c0_i32_0 = arith.constant 0 : i32
    return %c0_i32, %arg0 : i32, i32
  }
  func.func @transform_3(%arg0: i32, %arg1: i32) -> (i32, i32) {
    %c0_i32 = arith.constant 0 : i32
    %c0_i32_0 = arith.constant 0 : i32
    return %arg1, %c0_i32 : i32, i32
  }
  func.func @transform_4(%arg0: i32, %arg1: i32) -> (i32, i32) {
    %c0_i32 = arith.constant 0 : i32
    return %arg1, %arg0 : i32, i32
  }
}

</mosaic_0001>

<bundles_post_ra>
// kernel: language_model_forward.14
= control target key start
LH: loop header
LB: loop body
LE: loop exit
PB: predicated region body
PF: predicated region fallthrough
CT: control target
= control target key end

     0   :  { %v130_v0 = vmov 0.0   ;;  %vm131_vm0 = vmmov 0   ;;  %vm45_vm1 = vcmask 261120   ;;  %vm98_vm2 = vcmask 781312   ;;  %s170_s1 = inlined_call_operand.vmem [shape: bf16[32,96], index: 1, kind: input, shape index: {}]   ;;  %s171_s0 = inlined_call_operand.vmem [shape: bf16[16,32], index: 0, kind: input, shape index: {}]   ;;  %s172_s2 = inlined_call_operand.vmem [shape: f32[1,96], index: 2, kind: input, shape index: {}]   ;;  %s173_s3 = inlined_call_operand.vmem [shape: bf16[16,96], index: 3, kind: output, shape index: {}]  }
   0x1   :  { %117 = vmatprep.subr.bf16.mxu0 %v130_v0  ;;  %v127_v1 = vld [vmem:[%s170_s1] sm:$0xff]   ;;  %121 = vmatprep.mubr.msk.bf16.mxu0 %vm131_vm0, %v130_v0  ;;  %v128_v2 = vld [vmem:[%s170_s1 + $0x8] sm:$0xff]  }
   0x2   :  { %118 = vmatpush3.bf16.msra.mxu0 %v127_v1  ;;  %v129_v3 = vld [vmem:[%s171_s0] sm:$0xff]  }
   0x3   :  { %119 = vmatprep.subr.bf16.mxu0 %v130_v0  ;;  %v105_v4 = vld [vmem:[%s172_s2] ss:$0 sm:$0xff] }
   0x6   :  { %120 = vmatpush3.bf16.msra.mxu0 %v128_v2 }
   0x9   :  { %122 = vmatmul.mubr.msk.bf16.vlgmr.msra.gmra.mrb[0].mxu0 %vm45_vm1, %v129_v3 }
  0xdc   :  { %v83_v5 = vpop.f32.mrb[0].mxu0 }
  0xdd   :  { %v84_v6 = vadd.f32 %v105_v4, %v83_v5  ;;  %v123_v7 = vpop.f32.mrb[1].mxu0 }
  0xde   :  { %v86_v8 = vpop.f32.mrb[2].mxu0 }
  0xdf   :  { %v112_v9 = vpack.c.bf16 %v84_v6, %v84_v6  ;;  %v87_v10 = vadd.f32 %v105_v4, %v86_v8  ;;  %v124_v11 = vpop.f32.mrb[3].mxu0 }
  0xe1   :  { %99 = vst.msk [vmem:[%s173_s3] sm:$0xf] %vm98_vm2, %v112_v9  ;;  %v113_v12 = vpack.c.bf16 %v87_v10, %v87_v10 }
  0xe3   :  { %100 = vst.msk [vmem:[%s173_s3 + $0x4] sm:$0xf] %vm98_vm2, %v113_v12 }

// kernel: language_model_forward.13
= control target key start
LH: loop header
LB: loop body
LE: loop exit
PB: predicated region body
PF: predicated region fallthrough
CT: control target
= control target key end

     0   :  { %vm16_vm0 = vcmask 261120   ;;  %vm70_vm1 = vcmask 257024   ;;  %s129_s0 = inlined_call_operand.vmem [shape: f32[16,32], index: 0, kind: input, shape index: {}]   ;;  %s130_s1 = inlined_call_operand.vmem [shape: f32[1,32], index: 1, kind: input, shape index: {}]   ;;  %s131_s2 = inlined_call_operand.vmem [shape: f32[1,32], index: 2, kind: input, shape index: {}]   ;;  %s132_s3 = inlined_call_operand.vmem [shape: bf16[16,32], index: 3, kind: output, shape index: {}]  }
   0x1   :  { %v14_v0 = vld [vmem:[%s129_s0] sm:$0xff]  ;;  %v15_v1 = vld [vmem:[%s129_s0 + $0x8] sm:$0xff] }
   0x2   :  { %v17_v2 = vsel %vm16_vm0, %v14_v0, 0.0  ;;  %v20_v3 = vsel %vm16_vm0, %v15_v1, 0.0  ;;  %v77_v21 = vld [vmem:[%s130_s1] ss:$0 sm:$0xff] }
   0x3   :  { %18 = vadd.xlane.f32.xlu0 %v17_v2  ;;  %v78_v23 = vld [vmem:[%s131_s2] ss:$0 sm:$0xff] }
   0x7   :  { %21 = vadd.xlane.f32.xlu0 %v20_v3 }
  0x90   :  { %v19_v4 = vpop.xlane.xlu0 %18 }
  0x91   :  { %v24_v5 = vmul.f32 0.03125, %v19_v4 }
  0x93   :  { %v26_v6 = vsub.f32 %v14_v0, %v24_v5 }
  0x94   :  { %v22_v7 = vpop.xlane.xlu0 %21 }
  0x95   :  { %v25_v8 = vmul.f32 0.03125, %v22_v7  ;;  %v28_v9 = vmul.f32 %v26_v6, %v26_v6 }
  0x97   :  { %v27_v10 = vsub.f32 %v15_v1, %v25_v8  ;;  %v30_v11 = vsel %vm16_vm0, %v28_v9, 0.0 }
  0x98   :  { %31 = vadd.xlane.f32.xlu1 %v30_v11 }
  0x99   :  { %v29_v12 = vmul.f32 %v27_v10, %v27_v10 }
  0x9b   :  { %v33_v13 = vsel %vm16_vm0, %v29_v12, 0.0 }
  0x9c   :  { %34 = vadd.xlane.f32.xlu1 %v33_v13 }
 0x125   :  { %v32_v14 = vpop.xlane.xlu1 %31 }
 0x126   :  { %v36_v15 = vmul.f32 0.03125, %v32_v14 }
 0x128   :  { %v38_v16 = vadd.f32 1e-12, %v36_v15 }
 0x129   :  { %v35_v17 = vpop.xlane.xlu1 %34 }
 0x12a   :  { %83 = vrsqrt.f32 %v38_v16  ;;  %v37_v18 = vmul.f32 0.03125, %v35_v17 }
 0x12c   :  { %v39_v19 = vadd.f32 1e-12, %v37_v18 }
 0x12e   :  { %85 = vrsqrt.f32 %v39_v19 }
 0x134   :  { %v84_v20 = vpop.eup %83 }
 0x135   :  { %v42_v22 = vmul.f32 %v84_v20, %v26_v6 }
 0x137   :  { %v51_v24 = vmul.f32 %v77_v21, %v42_v22 }
 0x138   :  { %v86_v25 = vpop.eup %85 }
 0x139   :  { %v60_v26 = vadd.f32 %v78_v23, %v51_v24  ;;  %v43_v27 = vmul.f32 %v86_v25, %v27_v10 }
 0x13b   :  { %v81_v28 = vpack.c.bf16 %v60_v26, %v60_v26  ;;  %v52_v29 = vmul.f32 %v77_v21, %v43_v27 }
 0x13d   :  { %71 = vst.msk [vmem:[%s132_s3] sm:$0xf] %vm70_vm1, %v81_v28  ;;  %v61_v30 = vadd.f32 %v78_v23, %v52_v29 }
 0x13f   :  { %v82_v31 = vpack.c.bf16 %v61_v30, %v61_v30 }
 0x141   :  { %72 = vst.msk [vmem:[%s132_s3 + $0x4] sm:$0xf] %vm70_vm1, %v82_v31 }

// kernel: language_model_forward.15
= control target key start
LH: loop header
LB: loop body
LE: loop exit
PB: predicated region body
PF: predicated region fallthrough
CT: control target
= control target key end

     0   :  { %s713_s15 = smov 0   ;;  %s715_s16 = smov 0   ;;  %s784_s0 = inlined_call_operand.vmem [shape: bf16[2,4,8,8], index: 0, kind: input, shape index: {}]   ;;  %s785_s1 = inlined_call_operand.vmem [shape: bf16[2,4,8,8], index: 1, kind: input, shape index: {}]   ;;  %s786_s2 = inlined_call_operand.vmem [shape: bf16[2,4,8,8], index: 2, kind: input, shape index: {}]   ;;  %s787_s3 = inlined_call_operand.vmem [shape: f32[2,1,8], index: 3, kind: input, shape index: {}]   ;;  %s788_s4 = inlined_call_operand.vmem [shape: bf16[2,4,8,8], index: 4, kind: output, shape index: {}]  }
   0x1   :  { %s717_s17 = smov 0   ;;  %s719_s18 = smov 0  }
   0x2   :  { %s721_s19 = smov 0  }
   0x3 LB: > { %s23_s20 = sadd.s32 1, %s675_s17  ;;  %s26_s21 = sadd.s32 1, %s679_s18  ;;  %s683_s19 = sphi %s721_s19, %s14_s19   ;;  %s679_s18 = sphi %s719_s18, %s792_s18   ;;  %s675_s17 = sphi %s717_s17, %s791_s17   ;;  %s671_s16 = sphi %s715_s16, %s790_s16   ;;  %s667_s15 = sphi %s713_s15, %s789_s15  }
   0x4   : > { %p24_p0 = scmp.ge.s32.totalorder %s23_s20, 4  ;;  %p569_p1 = scmp.ge.s32.totalorder %s683_s19, 1 }
   0x5   : > { %p219_p2 = scmp.lt.s32.totalorder %s683_s19, 9 }
   0x6   : > { %s794_s20 = smov (%p24_p0, %s23_s20), 0  ;;  %s796_s21 = smov (!%p24_p0, %s26_s21), %s679_s18 }
   0x7   : > { %p220_p3 = pnand %p569_p1, %p219_p2  ;;  %p28_p4 = scmp.ge.s32.totalorder %s796_s21, 2 }
   0x8   : > { %p270_p5 = scmp.lt.s32.totalorder (!%p220_p3), %s671_s16, 1  ;;  %p272_p6 = scmp.lt.s32.totalorder (!%p220_p3), %s667_s15, 3  ;;  %v685_v0 = vmov (!%p220_p3), 0.0   ;;  %vm686_vm0 = vmmov (!%p220_p3), 0   ;;  %vm309_vm1 = vcmask (!%p220_p3), 64512   ;;  %v357_v4 = vlaneseq (!%p220_p3) }
   0x9   : > { %s798_s21 = smov (%p28_p4, %s796_s21), 0  ;;  %223 = sbr.rel (%p220_p3) target bundleno = 776 (0x308), region = 36 }
   0xa   : > { %586 = vmatprep.subr.bf16.mxu0 (!%p220_p3), %v685_v0  ;;  %588 = vmatprep.mubr.msk.bf16.mxu0 (!%p220_p3), %vm686_vm0, %v685_v0  ;;  %v358_v6 = vshrl.u32 (!%p220_p3), %v357_v4, 7  ;;  %v687_v8 = vmov (!%p220_p3), 0   ;;  %v360_v10 = vand.u32 (!%p220_p3), 127, %v357_v4  ;;  %vm387_vm6 = vcmask (!%p220_p3), 1043456  }
   0xb   : > { %592 = vmatprep.subr.bf16.mxu1 (!%p220_p3), %v685_v0  ;;  %594 = vmatprep.mubr.msk.bf16.mxu1 (!%p220_p3), %vm686_vm0, %v685_v0  ;;  %vm432_vm7 = vcmask (!%p220_p3), 60416  }
   0xc   : > { %v367_v7 = vsub.s32 (!%p220_p3), 0, %v358_v6  ;;  %vm363_vm3 = vcmp.le.s32.totalorder (!%p220_p3), %v360_v10, %v358_v6 }
  0x10   : > { %s800_s16 = smov (!%p270_p5, %s671_s16), 1  ;;  %s802_s15 = smov (!%p272_p6, %s667_s15), 3 }
  0x11   : > { %s570_s22 = sshll.u32 %s800_s16, 2  ;;  %s296_s7 = scalar_lea.vmem %s787_s3, %s800_s16 }
  0x12   : > { %s275_s23 = sadd.s32 %s570_s22, %s802_s15  ;;  %v361_v5 = vld [vmem:[%s296_s7] sm:$0x1] }
  0x13   : > { %s743_s24 = sshll.u32 %s275_s23, 2  ;;  %vm362_vm2 = vcmp.gt.f32.partialorder %v361_v5, 0.5 }
  0x14   : > { %s285_s27 = scalar_lea.vmem %s785_s1, %s743_s24  ;;  %s277_s30 = scalar_lea.vmem %s784_s0, %s743_s24  ;;  %v364_v9 = vsel %vm362_vm2, 1, %v687_v8 }
  0x15   : > { %v307_v1 = vld [vmem:[%s285_s27] sm:$0xf]  ;;  %v368_v11 = vrot.slane %v364_v9, %v367_v7  ;;  %s293_s10 = scalar_lea.vmem %s786_s2, %s743_s24  ;;  %s304_s13 = scalar_lea.vmem %s788_s4, %s743_s24 }
  0x16   : > { %v314_v2 = vsel %vm309_vm1, %v307_v1, 0  ;;  %v306_v3 = vld [vmem:[%s277_s30] sm:$0xf] }
  0x17   : > { %587 = vmatpush3.bf16.xpose.msra.mxu0 %v314_v2  ;;  %vm369_vm4 = vcmp.eq.s32.totalorder %v368_v11, 1  ;;  %v308_v24 = vld [vmem:[%s293_s10] sm:$0xf] }
  0x18   : > { %vm370_vm5 = vmand %vm363_vm3, %vm369_vm4  ;;  %v389_v25 = vsel %vm387_vm6, %v308_v24, 0 }
  0x19   : > { %593 = vmatpush3.bf16.msra.mxu1 %v389_v25 }
  0x1e   : > { %589 = vmatmul.mubr.msk.bf16.vlgmr.msra.gmra.mrb[0].mxu0 %vm309_vm1, %v306_v3 }
  0xf1   : > { %v350_v12 = vpop.f32.mrb[0].mxu0 }
  0xf2   : > { %v356_v13 = vmul.f32 0.35355338, %v350_v12  ;;  %v590_v14 = vpop.f32.mrb[1].mxu0 }
  0xf3   : > { %v353_v15 = vpop.f32.mrb[2].mxu0 }
  0xf4   : > { %v591_v16 = vpop.f32.mrb[3].mxu0  ;;  %v371_v17 = vsel %vm370_vm5, %v356_v13, -1e+09 }
  0xf5   : > { %v372_v18 = vsel %vm309_vm1, %v371_v17, -inf }
  0xf6   : > { %373 = vmax.xlane.f32.xlu0 %v372_v18 }
 0x183   : > { %v374_v19 = vpop.xlane.xlu0 %373 }
 0x184   : > { %v375_v20 = vsub.f32 %v371_v17, %v374_v19 }
 0x186   : > { %v376_v21 = vmul.f32 1.442695, %v375_v20 }
 0x188   : > { %641 = vpow2.f32 %v376_v21 }
 0x192   : > { %v642_v22 = vpop.eup %641 }
 0x193   : > { %v378_v23 = vsel %vm309_vm1, %v642_v22, 0.0 }
 0x194   : > { %379 = vadd.xlane.f32.xlu0 %v378_v23 }
 0x221   : > { %v380_v26 = vpop.xlane.xlu0 %379 }
 0x222   : > { %643 = vrcp.f32 %v380_v26 }
 0x22c   : > { %v644_v27 = vpop.eup %643 }
 0x22d   : > { %v382_v28 = vmul.f32 %v644_v27, %v642_v22 }
 0x22f   : > { %v383_v29 = vpack.c.bf16 %v382_v28, %v382_v28 }
 0x231   : > { %595 = vmatmul.mubr.msk.bf16.vlgmr.msra.gmra.mrb[0].mxu1 %vm309_vm1, %v383_v29 }
 0x304   : > { %v425_v30 = vpop.f32.mrb[0].mxu1 }
 0x305   : > { %v431_v31 = vpack.c.bf16 %v425_v30, %v425_v30  ;;  %v596_v32 = vpop.f32.mrb[1].mxu1 }
 0x306   : > { %v428_v33 = vpop.f32.mrb[2].mxu1 }
 0x307   : > { %433 = vst.msk [vmem:[%s304_s13] sm:$0xf] %vm432_vm7, %v431_v31  ;;  %v597_v34 = vpop.f32.mrb[3].mxu1 }
 0x308 PF: > { %s14_s19 = sadd.s32 1, %s683_s19   ;;  %s789_s15 = smov %s675_s17 }
 0x309   : > { %p11_p7 = scmp.ge.s32.totalorder %s14_s19, 10   ;;  %s790_s16 = smov %s679_s18 }
 0x30a   : > { %s791_s17 = smov %s794_s20  ;;  %s792_s18 = smov %s798_s21 }
 0x30b   :  { %13 = sbr.rel (!%p11_p7) target bundleno = 3 (0x3), region = 75 }

// kernel: language_model_forward.16
= control target key start
LH: loop header
LB: loop body
LE: loop exit
PB: predicated region body
PF: predicated region fallthrough
CT: control target
= control target key end

     0   :  { %v200_v0 = vmov 0.0   ;;  %vm201_vm0 = vmmov 0   ;;  %vm54_vm1 = vcmask 261120   ;;  %vm158_vm2 = vcmask 257024   ;;  %s269_s1 = inlined_call_operand.vmem [shape: bf16[32,32], index: 1, kind: input, shape index: {}]   ;;  %s270_s0 = inlined_call_operand.vmem [shape: bf16[16,32], index: 0, kind: input, shape index: {}]   ;;  %s271_s3 = inlined_call_operand.vmem [shape: bf16[16,32], index: 3, kind: input, shape index: {}]   ;;  %s272_s2 = inlined_call_operand.vmem [shape: f32[1,32], index: 2, kind: input, shape index: {}]   ;;  %s273_s4 = inlined_call_operand.vmem [shape: f32[1,32], index: 4, kind: input, shape index: {}]   ;;  %s274_s5 = inlined_call_operand.vmem [shape: f32[1,32], index: 5, kind: input, shape index: {}]   ;;  %s275_s6 = inlined_call_operand.vmem [shape: bf16[16,32], index: 6, kind: output, shape index: {}]  }
   0x1   :  { %183 = vmatprep.subr.bf16.mxu0 %v200_v0  ;;  %v193_v1 = vld [vmem:[%s269_s1] sm:$0xff]   ;;  %187 = vmatprep.mubr.msk.bf16.mxu0 %vm201_vm0, %v200_v0  ;;  %v194_v2 = vld [vmem:[%s269_s1 + $0x8] sm:$0xff]  }
   0x2   :  { %184 = vmatpush3.bf16.msra.mxu0 %v193_v1  ;;  %v195_v3 = vld [vmem:[%s270_s0] sm:$0xff]  }
   0x3   :  { %185 = vmatprep.subr.bf16.mxu0 %v200_v0  ;;  %v177_v4 = vld [vmem:[%s271_s3] sm:$0xff]  }
   0x4   :  { %v165_v5 = vld [vmem:[%s272_s2] ss:$0 sm:$0xff]  ;;  %v178_v6 = vunpack.c.l.bf16 %v177_v4  ;;  %v179_v10 = vunpack.c.h.bf16 %v177_v4 }
   0x5   :  { %v170_v35 = vld [vmem:[%s273_s4] ss:$0 sm:$0xff] }
   0x6   :  { %186 = vmatpush3.bf16.msra.mxu0 %v194_v2  ;;  %v171_v37 = vld [vmem:[%s274_s5] ss:$0 sm:$0xff] }
   0x9   :  { %188 = vmatmul.mubr.msk.bf16.vlgmr.msra.gmra.mrb[0].mxu0 %vm54_vm1, %v195_v3 }
  0xdc   :  { %v92_v7 = vpop.f32.mrb[0].mxu0 }
  0xdd   :  { %v93_v8 = vadd.f32 %v165_v5, %v92_v7  ;;  %v189_v9 = vpop.f32.mrb[1].mxu0 }
  0xde   :  { %v95_v11 = vpop.f32.mrb[2].mxu0 }
  0xdf   :  { %v96_v12 = vadd.f32 %v165_v5, %v95_v11  ;;  %v190_v13 = vpop.f32.mrb[3].mxu0  ;;  %v103_v14 = vadd.f32 %v178_v6, %v93_v8 }
  0xe1   :  { %v105_v15 = vsel %vm54_vm1, %v103_v14, 0.0  ;;  %v104_v16 = vadd.f32 %v179_v10, %v96_v12 }
  0xe2   :  { %106 = vadd.xlane.f32.xlu0 %v105_v15 }
  0xe3   :  { %v108_v17 = vsel %vm54_vm1, %v104_v16, 0.0 }
  0xe6   :  { %109 = vadd.xlane.f32.xlu0 %v108_v17 }
 0x16f   :  { %v107_v18 = vpop.xlane.xlu0 %106 }
 0x170   :  { %v112_v19 = vmul.f32 0.03125, %v107_v18 }
 0x172   :  { %v114_v20 = vsub.f32 %v103_v14, %v112_v19 }
 0x173   :  { %v110_v21 = vpop.xlane.xlu0 %109 }
 0x174   :  { %v113_v22 = vmul.f32 0.03125, %v110_v21  ;;  %v116_v23 = vmul.f32 %v114_v20, %v114_v20 }
 0x176   :  { %v115_v24 = vsub.f32 %v104_v16, %v113_v22  ;;  %v118_v25 = vsel %vm54_vm1, %v116_v23, 0.0 }
 0x177   :  { %119 = vadd.xlane.f32.xlu1 %v118_v25 }
 0x178   :  { %v117_v26 = vmul.f32 %v115_v24, %v115_v24 }
 0x17a   :  { %v121_v27 = vsel %vm54_vm1, %v117_v26, 0.0 }
 0x17b   :  { %122 = vadd.xlane.f32.xlu1 %v121_v27 }
 0x204   :  { %v120_v28 = vpop.xlane.xlu1 %119 }
 0x205   :  { %v124_v29 = vmul.f32 0.03125, %v120_v28 }
 0x207   :  { %v126_v30 = vadd.f32 1e-12, %v124_v29 }
 0x208   :  { %v123_v31 = vpop.xlane.xlu1 %122 }
 0x209   :  { %196 = vrsqrt.f32 %v126_v30  ;;  %v125_v32 = vmul.f32 0.03125, %v123_v31 }
 0x20b   :  { %v127_v33 = vadd.f32 1e-12, %v125_v32 }
 0x20d   :  { %198 = vrsqrt.f32 %v127_v33 }
 0x213   :  { %v197_v34 = vpop.eup %196 }
 0x214   :  { %v130_v36 = vmul.f32 %v197_v34, %v114_v20 }
 0x216   :  { %v139_v38 = vmul.f32 %v170_v35, %v130_v36 }
 0x217   :  { %v199_v39 = vpop.eup %198 }
 0x218   :  { %v148_v40 = vadd.f32 %v171_v37, %v139_v38  ;;  %v131_v41 = vmul.f32 %v199_v39, %v115_v24 }
 0x21a   :  { %v174_v42 = vpack.c.bf16 %v148_v40, %v148_v40  ;;  %v140_v43 = vmul.f32 %v170_v35, %v131_v41 }
 0x21c   :  { %159 = vst.msk [vmem:[%s275_s6] sm:$0xf] %vm158_vm2, %v174_v42  ;;  %v149_v44 = vadd.f32 %v171_v37, %v140_v43 }
 0x21e   :  { %v175_v45 = vpack.c.bf16 %v149_v44, %v149_v44 }
 0x220   :  { %160 = vst.msk [vmem:[%s275_s6 + $0x4] sm:$0xf] %vm158_vm2, %v175_v45 }

// kernel: language_model_forward.17
= control target key start
LH: loop header
LB: loop body
LE: loop exit
PB: predicated region body
PF: predicated region fallthrough
CT: control target
= control target key end

     0   :  { %v152_v0 = vmov 0.0   ;;  %vm153_vm0 = vmmov 0   ;;  %vm45_vm1 = vcmask 261120   ;;  %vm116_vm2 = vcmask 519168   ;;  %s192_s1 = inlined_call_operand.vmem [shape: bf16[32,64], index: 1, kind: input, shape index: {}]   ;;  %s193_s0 = inlined_call_operand.vmem [shape: bf16[16,32], index: 0, kind: input, shape index: {}]   ;;  %s194_s2 = inlined_call_operand.vmem [shape: f32[1,64], index: 2, kind: input, shape index: {}]   ;;  %s195_s3 = inlined_call_operand.vmem [shape: bf16[16,64], index: 3, kind: output, shape index: {}]  }
   0x1   :  { %135 = vmatprep.subr.bf16.mxu0 %v152_v0  ;;  %v145_v1 = vld [vmem:[%s192_s1] sm:$0xff]   ;;  %139 = vmatprep.mubr.msk.bf16.mxu0 %vm153_vm0, %v152_v0  ;;  %v146_v2 = vld [vmem:[%s192_s1 + $0x8] sm:$0xff]  }
   0x2   :  { %136 = vmatpush3.bf16.msra.mxu0 %v145_v1  ;;  %v147_v3 = vld [vmem:[%s193_s0] sm:$0xff]  }
   0x3   :  { %137 = vmatprep.subr.bf16.mxu0 %v152_v0  ;;  %v123_v4 = vld [vmem:[%s194_s2] ss:$0 sm:$0xff] }
   0x6   :  { %138 = vmatpush3.bf16.msra.mxu0 %v146_v2 }
   0x9   :  { %140 = vmatmul.mubr.msk.bf16.vlgmr.msra.gmra.mrb[0].mxu0 %vm45_vm1, %v147_v3 }
  0xdc   :  { %v83_v5 = vpop.f32.mrb[0].mxu0 }
  0xdd   :  { %v84_v6 = vadd.f32 %v123_v4, %v83_v5  ;;  %v141_v7 = vpop.f32.mrb[1].mxu0 }
  0xde   :  { %v86_v8 = vpop.f32.mrb[2].mxu0 }
  0xdf   :  { %v92_v9 = vmul.f32 0.044715, %v84_v6  ;;  %v87_v10 = vadd.f32 %v123_v4, %v86_v8  ;;  %v142_v11 = vpop.f32.mrb[3].mxu0  ;;  %v90_v22 = vmul.f32 0.5, %v84_v6 }
  0xe1   :  { %v94_v12 = vmul.f32 %v92_v9, %v84_v6  ;;  %v93_v13 = vmul.f32 0.044715, %v87_v10  ;;  %v91_v26 = vmul.f32 0.5, %v87_v10 }
  0xe3   :  { %v96_v14 = vmul.f32 %v94_v12, %v84_v6  ;;  %v95_v15 = vmul.f32 %v93_v13, %v87_v10 }
  0xe5   :  { %v98_v16 = vadd.f32 %v96_v14, %v84_v6  ;;  %v97_v17 = vmul.f32 %v95_v15, %v87_v10 }
  0xe7   :  { %v100_v18 = vmul.f32 0.7978846, %v98_v16  ;;  %v99_v19 = vadd.f32 %v97_v17, %v87_v10 }
  0xe9   :  { %148 = vtanh.f32 %v100_v18  ;;  %v101_v20 = vmul.f32 0.7978846, %v99_v19 }
  0xeb   :  { %150 = vtanh.f32 %v101_v20 }
  0xf3   :  { %v149_v21 = vpop.eup %148 }
  0xf4   :  { %v104_v23 = vadd.f32 1.0, %v149_v21 }
  0xf5   :  { %v151_v24 = vpop.eup %150 }
  0xf6   :  { %v106_v25 = vmul.f32 %v104_v23, %v90_v22  ;;  %v105_v27 = vadd.f32 1.0, %v151_v24 }
  0xf8   :  { %v130_v28 = vpack.c.bf16 %v106_v25, %v106_v25  ;;  %v107_v29 = vmul.f32 %v105_v27, %v91_v26 }
  0xfa   :  { %117 = vst.msk [vmem:[%s195_s3] sm:$0xf] %vm116_vm2, %v130_v28  ;;  %v131_v30 = vpack.c.bf16 %v107_v29, %v107_v29 }
  0xfc   :  { %118 = vst.msk [vmem:[%s195_s3 + $0x4] sm:$0xf] %vm116_vm2, %v131_v30 }

// kernel: language_model_forward.24
= control target key start
LH: loop header
LB: loop body
LE: loop exit
PB: predicated region body
PF: predicated region fallthrough
CT: control target
= control target key end

     0   :  { %v200_v0 = vmov 0.0   ;;  %vm201_vm0 = vmmov 0   ;;  %vm54_vm1 = vcmask 261120   ;;  %vm19_vm2 = vcmask 7168   ;;  %s252_s1 = inlined_call_operand.vmem [shape: bf16[32,128], index: 1, kind: input, shape index: {}]   ;;  %s253_s0 = inlined_call_operand.vmem [shape: bf16[16,32], index: 0, kind: input, shape index: {}]   ;;  %s254_s2 = inlined_call_operand.vmem [shape: f32[1,128], index: 2, kind: input, shape index: {}]   ;;  %s255_s3 = inlined_call_operand.vmem [shape: f32[16,1], index: 3, kind: output, shape index: {}]  }
   0x1   :  { %171 = vmatprep.subr.bf16.mxu0 %v200_v0  ;;  %v185_v1 = vld [vmem:[%s252_s1] sm:$0xff]   ;;  %175 = vmatprep.mubr.msk.bf16.mxu0 %vm201_vm0, %v200_v0  ;;  %v186_v2 = vld [vmem:[%s252_s1 + $0x8] sm:$0xff]   ;;  %v202_v4 = vmov -inf   ;;  %22 = vst.msk [vmem:[#allocation3] sm:$0xff] %vm19_vm2, %v200_v0  ;;  %23 = vst.msk [vmem:[#allocation3 + $0x8] sm:$0xff] %vm19_vm2, %v200_v0  ;;  %v203_v12 = vmov 0  }
   0x2   :  { %172 = vmatpush3.bf16.msra.mxu0 %v185_v1  ;;  %v187_v3 = vld [vmem:[%s253_s0] sm:$0xff]   ;;  %20 = vst.msk [vmem:[#allocation2] sm:$0xff] %vm19_vm2, %v202_v4  ;;  %21 = vst.msk [vmem:[#allocation2 + $0x8] sm:$0xff] %vm19_vm2, %v202_v4  ;;  %183 = vset.pattern.permute.xlu1 %v203_v12 }
   0x3   :  { %173 = vmatprep.subr.bf16.mxu0 %v200_v0  ;;  %v163_v5 = vld [vmem:[%s254_s2] ss:$0 sm:$0xff]  ;;  %184 = vset.pattern.permute.xlu0 %v203_v12 }
   0x6   :  { %174 = vmatpush3.bf16.msra.mxu0 %v186_v2 }
   0x8   :  { %v107_v32 = vld [vmem:[#allocation3] sm:$0xff]  ;;  %v108_v36 = vld [vmem:[#allocation3 + $0x8] sm:$0xff] }
   0x9   :  { %176 = vmatmul.mubr.msk.bf16.vlgmr.msra.gmra.mrb[0].mxu0 %vm54_vm1, %v187_v3  ;;  %v99_v13 = vld [vmem:[#allocation2] sm:$0xff]  ;;  %v100_v16 = vld [vmem:[#allocation2 + $0x8] sm:$0xff] }
  0xdc   :  { %v92_v6 = vpop.f32.mrb[0].mxu0 }
  0xdd   :  { %v93_v7 = vadd.f32 %v163_v5, %v92_v6  ;;  %v177_v8 = vpop.f32.mrb[1].mxu0 }
  0xde   :  { %v95_v9 = vpop.f32.mrb[2].mxu0 }
  0xdf   :  { %101 = vmax.xlane.f32.xlu0 %v93_v7  ;;  %v178_v10 = vpop.f32.mrb[3].mxu0  ;;  %v96_v11 = vadd.f32 %v163_v5, %v95_v9 }
  0xe3   :  { %103 = vmax.xlane.f32.xlu0 %v96_v11 }
 0x16c   :  { %v102_v14 = vpop.xlane.xlu0 %101 }
 0x16d   :  { %v105_v15 = vmax.f32 %v99_v13, %v102_v14 }
 0x16f   :  { %v109_v17 = vsub.f32 %v99_v13, %v105_v15  ;;  %142 = vst.msk [vmem:[#allocation2] sm:$0xff] %vm19_vm2, %v105_v15  ;;  %119 = vperm.xlu1 %183, %v105_v15  }
 0x170   :  { %v104_v18 = vpop.xlane.xlu0 %103 }
 0x171   :  { %v106_v19 = vmax.f32 %v100_v16, %v104_v18  ;;  %v111_v29 = vmul.f32 1.442695, %v109_v17 }
 0x173   :  { %v110_v20 = vsub.f32 %v100_v16, %v106_v19  ;;  %143 = vst.msk [vmem:[#allocation2 + $0x8] sm:$0xff] %vm19_vm2, %v106_v19  ;;  %124 = vperm.xlu1 %183, %v106_v19  }
 0x175   :  { %v113_v30 = vmul.f32 1.442695, %v110_v20 }
 0x176   :  { %v147_v45 = vld [vmem:[#allocation2] sm:$0xff] }
 0x17a   :  { %v148_v49 = vld [vmem:[#allocation2 + $0x8] sm:$0xff] }
 0x1ee   :  { %v120_v21 = vpop.permute.xlu1 %119 }
 0x1ef   :  { %v127_v22 = vsub.f32 %v93_v7, %v120_v21 }
 0x1f1   :  { %v129_v23 = vmul.f32 1.442695, %v127_v22 }
 0x1f2   :  { %v125_v24 = vpop.permute.xlu1 %124 }
 0x1f3   :  { %188 = vpow2.f32 %v129_v23  ;;  %v128_v25 = vsub.f32 %v96_v11, %v125_v24 }
 0x1f5   :  { %v131_v26 = vmul.f32 1.442695, %v128_v25 }
 0x1f7   :  { %190 = vpow2.f32 %v131_v26 }
 0x1f8   :  { %192 = vpow2.f32 %v111_v29 }
 0x1f9   :  { %194 = vpow2.f32 %v113_v30 }
 0x1fd   :  { %v189_v27 = vpop.eup %188 }
 0x1fe   :  { %133 = vadd.xlane.f32.xlu0 %v189_v27 }
 0x201   :  { %v191_v28 = vpop.eup %190 }
 0x202   :  { %135 = vadd.xlane.f32.xlu1 %v191_v28  ;;  %v193_v31 = vpop.eup %192 }
 0x203   :  { %v115_v33 = vmul.f32 %v193_v31, %v107_v32  ;;  %v195_v34 = vpop.eup %194 }
 0x204   :  { %v116_v38 = vmul.f32 %v195_v34, %v108_v36 }
 0x28b   :  { %v134_v35 = vpop.xlane.xlu0 %133 }
 0x28c   :  { %v137_v37 = vadd.f32 %v134_v35, %v115_v33 }
 0x28e   :  { %140 = vst.msk [vmem:[#allocation3] sm:$0xff] %vm19_vm2, %v137_v37 }
 0x28f   :  { %v136_v39 = vpop.xlane.xlu1 %135 }
 0x290   :  { %v138_v40 = vadd.f32 %v136_v39, %v116_v38 }
 0x292   :  { %141 = vst.msk [vmem:[#allocation3 + $0x8] sm:$0xff] %vm19_vm2, %v138_v40 }
 0x295   :  { %v149_v41 = vld [vmem:[#allocation3] sm:$0xff] }
 0x296   :  { %196 = vlog2.f32 %v149_v41 }
 0x299   :  { %v150_v42 = vld [vmem:[#allocation3 + $0x8] sm:$0xff] }
 0x29a   :  { %198 = vlog2.f32 %v150_v42 }
 0x2a0   :  { %v197_v43 = vpop.eup %196 }
 0x2a1   :  { %v152_v44 = vmul.f32 0.6931472, %v197_v43 }
 0x2a3   :  { %v155_v46 = vadd.f32 %v152_v44, %v147_v45 }
 0x2a4   :  { %v199_v47 = vpop.eup %198 }
 0x2a5   :  { %157 = vst.msk [vmem:[%s255_s3] sm:$0xff] %vm19_vm2, %v155_v46  ;;  %v154_v48 = vmul.f32 0.6931472, %v199_v47 }
 0x2a7   :  { %v156_v50 = vadd.f32 %v154_v48, %v148_v49 }
 0x2a9   :  { %158 = vst.msk [vmem:[%s255_s3 + $0x8] sm:$0xff] %vm19_vm2, %v156_v50 }

// kernel: language_model_forward.18
= control target key start
LH: loop header
LB: loop body
LE: loop exit
PB: predicated region body
PF: predicated region fallthrough
CT: control target
= control target key end

     0   :  { %v227_v0 = vmov 0.0   ;;  %vm228_vm0 = vmmov 0   ;;  %vm70_vm1 = vcmask 523264   ;;  %vm121_vm2 = vcmask 261120   ;;  %s301_s1 = inlined_call_operand.vmem [shape: bf16[64,32], index: 1, kind: input, shape index: {}]   ;;  %s302_s0 = inlined_call_operand.vmem [shape: bf16[16,64], index: 0, kind: input, shape index: {}]   ;;  %s303_s3 = inlined_call_operand.vmem [shape: bf16[16,32], index: 3, kind: input, shape index: {}]   ;;  %s304_s2 = inlined_call_operand.vmem [shape: f32[1,32], index: 2, kind: input, shape index: {}]   ;;  %s305_s4 = inlined_call_operand.vmem [shape: f32[1,32], index: 4, kind: input, shape index: {}]   ;;  %s306_s5 = inlined_call_operand.vmem [shape: f32[1,32], index: 5, kind: input, shape index: {}]   ;;  %s307_s6 = inlined_call_operand.vmem [shape: bf16[16,32], index: 6, kind: output, shape index: {}]  }
   0x1   :  { %204 = vmatprep.subr.bf16.mxu0 %v227_v0  ;;  %v218_v1 = vld [vmem:[%s301_s1] sm:$0xff]   ;;  %212 = vmatprep.mubr.msk.bf16.mxu0 %vm228_vm0, %v227_v0  ;;  %v219_v2 = vld [vmem:[%s301_s1 + $0x8] sm:$0xff]   ;;  %v220_v3 = vld [vmem:[%s301_s1 + $0x10] sm:$0xff]   ;;  %vm175_vm3 = vcmask 257024  }
   0x2   :  { %205 = vmatpush3.bf16.msra.mxu0 %v218_v1  ;;  %v221_v4 = vld [vmem:[%s301_s1 + $0x18] sm:$0xff]   ;;  %v222_v5 = vld [vmem:[%s302_s0] sm:$0xff]  }
   0x3   :  { %206 = vmatprep.subr.bf16.mxu0 %v227_v0  ;;  %v196_v6 = vld [vmem:[%s303_s3] sm:$0xff]  }
   0x4   :  { %v182_v7 = vld [vmem:[%s304_s2] ss:$0 sm:$0xff]  ;;  %v197_v8 = vunpack.c.l.bf16 %v196_v6  ;;  %v198_v12 = vunpack.c.h.bf16 %v196_v6 }
   0x5   :  { %v189_v37 = vld [vmem:[%s305_s4] ss:$0 sm:$0xff] }
   0x6   :  { %207 = vmatpush3.bf16.msra.mxu0 %v219_v2  ;;  %v190_v39 = vld [vmem:[%s306_s5] ss:$0 sm:$0xff] }
   0x7   :  { %208 = vmatprep.subr.bf16.mxu0 %v227_v0 }
   0xa   :  { %209 = vmatpush3.bf16.msra.mxu0 %v220_v3 }
   0xb   :  { %210 = vmatprep.subr.bf16.mxu0 %v227_v0 }
   0xe   :  { %211 = vmatpush3.bf16.msra.mxu0 %v221_v4 }
  0x11   :  { %213 = vmatmul.mubr.msk.bf16.vlgmr.msra.gmra.mrb[0].mxu0 %vm70_vm1, %v222_v5 }
  0xe4   :  { %v108_v9 = vpop.f32.mrb[0].mxu0 }
  0xe5   :  { %v109_v10 = vadd.f32 %v182_v7, %v108_v9  ;;  %v214_v11 = vpop.f32.mrb[1].mxu0 }
  0xe6   :  { %v111_v13 = vpop.f32.mrb[2].mxu0 }
  0xe7   :  { %v112_v14 = vadd.f32 %v182_v7, %v111_v13  ;;  %v215_v15 = vpop.f32.mrb[3].mxu0  ;;  %v119_v16 = vadd.f32 %v197_v8, %v109_v10 }
  0xe9   :  { %v122_v17 = vsel %vm121_vm2, %v119_v16, 0.0  ;;  %v120_v18 = vadd.f32 %v198_v12, %v112_v14 }
  0xea   :  { %123 = vadd.xlane.f32.xlu0 %v122_v17 }
  0xeb   :  { %v125_v19 = vsel %vm121_vm2, %v120_v18, 0.0 }
  0xee   :  { %126 = vadd.xlane.f32.xlu0 %v125_v19 }
 0x177   :  { %v124_v20 = vpop.xlane.xlu0 %123 }
 0x178   :  { %v129_v21 = vmul.f32 0.03125, %v124_v20 }
 0x17a   :  { %v131_v22 = vsub.f32 %v119_v16, %v129_v21 }
 0x17b   :  { %v127_v23 = vpop.xlane.xlu0 %126 }
 0x17c   :  { %v130_v24 = vmul.f32 0.03125, %v127_v23  ;;  %v133_v25 = vmul.f32 %v131_v22, %v131_v22 }
 0x17e   :  { %v132_v26 = vsub.f32 %v120_v18, %v130_v24  ;;  %v135_v27 = vsel %vm121_vm2, %v133_v25, 0.0 }
 0x17f   :  { %136 = vadd.xlane.f32.xlu1 %v135_v27 }
 0x180   :  { %v134_v28 = vmul.f32 %v132_v26, %v132_v26 }
 0x182   :  { %v138_v29 = vsel %vm121_vm2, %v134_v28, 0.0 }
 0x183   :  { %139 = vadd.xlane.f32.xlu1 %v138_v29 }
 0x20c   :  { %v137_v30 = vpop.xlane.xlu1 %136 }
 0x20d   :  { %v141_v31 = vmul.f32 0.03125, %v137_v30 }
 0x20f   :  { %v143_v32 = vadd.f32 1e-12, %v141_v31 }
 0x210   :  { %v140_v33 = vpop.xlane.xlu1 %139 }
 0x211   :  { %223 = vrsqrt.f32 %v143_v32  ;;  %v142_v34 = vmul.f32 0.03125, %v140_v33 }
 0x213   :  { %v144_v35 = vadd.f32 1e-12, %v142_v34 }
 0x215   :  { %225 = vrsqrt.f32 %v144_v35 }
 0x21b   :  { %v224_v36 = vpop.eup %223 }
 0x21c   :  { %v147_v38 = vmul.f32 %v224_v36, %v131_v22 }
 0x21e   :  { %v156_v40 = vmul.f32 %v189_v37, %v147_v38 }
 0x21f   :  { %v226_v41 = vpop.eup %225 }
 0x220   :  { %v165_v42 = vadd.f32 %v190_v39, %v156_v40  ;;  %v148_v43 = vmul.f32 %v226_v41, %v132_v26 }
 0x222   :  { %v193_v44 = vpack.c.bf16 %v165_v42, %v165_v42  ;;  %v157_v45 = vmul.f32 %v189_v37, %v148_v43 }
 0x224   :  { %176 = vst.msk [vmem:[%s307_s6] sm:$0xf] %vm175_vm3, %v193_v44  ;;  %v166_v46 = vadd.f32 %v190_v39, %v157_v45 }
 0x226   :  { %v194_v47 = vpack.c.bf16 %v166_v46, %v166_v46 }
 0x228   :  { %177 = vst.msk [vmem:[%s307_s6 + $0x4] sm:$0xf] %vm175_vm3, %v194_v47 }

// kernel: language_model_forward.25
= control target key start
LH: loop header
LB: loop body
LE: loop exit
PB: predicated region body
PF: predicated region fallthrough
CT: control target
= control target key end

     0   :  { %v201_v1 = vmov 0.0   ;;  %vm202_vm0 = vmmov 0   ;;  %s262_s0 = inlined_call_operand.vmem [shape: bf16[16,32], index: 0, kind: input, shape index: {}]   ;;  %s263_s1 = inlined_call_operand.vmem [shape: bf16[32,128], index: 1, kind: input, shape index: {}]   ;;  %s264_s2 = inlined_call_operand.vmem [shape: f32[1,128], index: 2, kind: input, shape index: {}]   ;;  %s265_s3 = inlined_call_operand.vmem [shape: f32[16,1], index: 3, kind: input, shape index: {}]   ;;  %s266_s4 = inlined_call_operand.hbm [shape: bf16[16,128], index: 4, kind: output, shape index: {}]  }
   0x1   :  { %v170_v0 = vld [vmem:[%s263_s1] sm:$0xff]   ;;  %155 = vmatprep.subr.bf16.mxu0 %v201_v1  ;;  %v171_v2 = vld [vmem:[%s263_s1 + $0x8] sm:$0xff]   ;;  %159 = vmatprep.mubr.msk.bf16.mxu0 %vm202_vm0, %v201_v1 }
   0x2   :  { %156 = vmatpush3.bf16.msra.mxu0 %v170_v0  ;;  %v94_v3 = vld [vmem:[%s265_s3] sm:$0xff] }
   0x3   :  { %157 = vmatprep.subr.bf16.mxu0 %v201_v1 }
   0x4   :  { %9 = vsyncpa [#allocation3], 0  ;;  %v203_v4 = vmov 0   ;;  %v172_v5 = vld [vmem:[%s262_s0] sm:$0xff]   ;;  %vm49_vm1 = vcmask 261120   ;;  %v95_v6 = vld [vmem:[%s265_s3 + $0x8] sm:$0xff] }
   0x5   :  { %169 = vset.pattern.permute.xlu0 %v203_v4  ;;  %v138_v8 = vld [vmem:[%s264_s2] ss:$0 sm:$0xff]  ;;  %s204_s0 = smov [#allocation2]  }
   0x6   :  { %98 = vperm.xlu0 %169, %v94_v3   ;;  %158 = vmatpush3.bf16.msra.mxu0 %v171_v2  ;;  %s127_s3 = sshll.u32 %s204_s0, 4  ;;  %s128_s3 = int_to_ptr.vmem [resolvable:$true] %s127_s3 }
   0x7   :  { %s177_s2 = scalar_lea.vmem %s128_s3, 128  ;;  %p182_p1 = scmp.lt.s32.totalorder %s128_s3, %s128_s3 }
   0x8   :  { %p178_p0 = scmp.ne.s32.totalorder %s128_s3, %s177_s2  ;;  %p183_p2 = scmp.lt.s32.totalorder %s177_s2, %s177_s2 }
   0x9   :  { %160 = vmatmul.mubr.msk.bf16.vlgmr.msra.gmra.mrb[0].mxu0 %vm49_vm1, %v172_v5 }
   0xa   :  { %103 = vperm.xlu0 %169, %v95_v6   ;;  %p184_p3 = por %p183_p2, %p182_p1 }
   0xc   :  { %p185_p4 = pnand %p184_p3, %p178_p0 }
  0x85   :  { %v99_v7 = vpop.permute.xlu0 %98 }
  0x89   :  { %v104_v16 = vpop.permute.xlu0 %103 }
  0xdc   :  { %v87_v9 = vpop.f32.mrb[0].mxu0 }
  0xdd   :  { %v88_v10 = vadd.f32 %v138_v8, %v87_v9  ;;  %v161_v11 = vpop.f32.mrb[1].mxu0 }
  0xde   :  { %v90_v12 = vpop.f32.mrb[2].mxu0 }
  0xdf   :  { %v106_v13 = vsub.f32 %v88_v10, %v99_v7  ;;  %v91_v14 = vadd.f32 %v138_v8, %v90_v12  ;;  %v162_v15 = vpop.f32.mrb[3].mxu0 }
  0xe1   :  { %v108_v17 = vmul.f32 1.442695, %v106_v13  ;;  %v107_v18 = vsub.f32 %v91_v14, %v104_v16 }
  0xe3   :  { %v110_v19 = vmul.f32 1.442695, %v107_v18  ;;  %173 = vpow2.f32 %v108_v17 }
  0xe5   :  { %175 = vpow2.f32 %v110_v19 }
  0xed   :  { %v174_v20 = vpop.eup %173 }
  0xef   :  { %v176_v21 = vpop.eup %175 }
  0xf0   :  { %v150_v22 = vpack.c.bf16 %v176_v21, %v174_v20 }
  0xf2   :  { %151 = vst [vmem:[#allocation2] sm:$0xff] %v150_v22  }
  0xf3   :  { %188 = shalt.err (!%p185_p4)
}
  0xf4   :  { %s189_s28 = scalar_lea.hbm %s266_s4, 128 }
  0xf5   :  { %p190_p5 = scmp.ne.s32.totalorder %s266_s4, %s189_s28  ;;  %p193_p6 = scmp.lt.u32.totalorder %s189_s28, %s266_s4 }
  0xf7   :  { %p195_p7 = pnand %p193_p6, %p190_p5 }
  0xf9   :  { %198 = shalt.err (!%p195_p7)
}
  0xfa   :  { %s205_s7 = smov 64   ;;  %s206_s8 = smov 4  }
  0xfb   :  { %133 = dma.vmem_to_hbm [thread:$0]  %s128_s3, 128, %s266_s4, [#allocation3], %s205_s7, %s205_s7, %s206_s8  }
  0xfc   :  { %199 = dma.done.wait [#allocation3], 128  }
  0xfd   :  { %200 = vsyncadd [#allocation3], 4294967168 }
  0xfe   :  { %137 = vsyncpa [#allocation3], 1 }

</bundles_post_ra>
